<compile_context>
chip_gen: v7x
topology: tpu7x:2x2x1
jax: 0.10.0
libtpu: 0.0.40
codegen_flags: <defaults>
</compile_context>

<pallas_src>
import math

import jax
import jax.numpy as jnp
from jax import lax
from jax.experimental import pallas as pl
from jax.experimental.pallas import tpu as pltpu

# ---- small ViT config (stand-in for vit_base_patch16_384: 768-dim, 12 heads, 12 blocks) ----
IMG = 32          # image size (stand-in for 384)
PATCH = 8         # patch size (stand-in for 16)
IN_CH = 3
EMBED = 64        # stand-in for 768
HEADS = 4         # stand-in for 12
HEAD_DIM = EMBED // HEADS
DEPTH = 2         # stand-in for 12 blocks
MLP = EMBED * 4
N_PATCH = (IMG // PATCH) ** 2
SEQ = N_PATCH + 1
SEQ_PAD = ((SEQ + 7) // 8) * 8          # pad token axis to a sublane multiple (17 -> 24)
CPP = IN_CH * PATCH * PATCH             # flattened patch length
LN_EPS = 1e-6                           # timm ViT LayerNorm eps
ATTN_SCALE = 1.0 / math.sqrt(HEAD_DIM)


# ----------------------------- in-kernel helpers (f32) -----------------------------

def _ln(x, g, b):
    mean = jnp.mean(x, axis=-1, keepdims=True)
    xc = x - mean
    var = jnp.mean(xc * xc, axis=-1, keepdims=True)
    return xc * lax.rsqrt(var + LN_EPS) * g + b


def _gelu(x):  # exact (erf) GELU, matching torch.nn.GELU default
    return 0.5 * x * (1.0 + lax.erf(x * (1.0 / math.sqrt(2.0))))


def _bf16(x):  # bf16 at the MXU inputs; accumulation stays f32
    return x.astype(jnp.bfloat16)


# ----------------------------- patch embed kernel -----------------------------

def _embed_kernel(p_ref, w_ref, b_ref, cls_ref, pos_ref, o_ref):
    patches = p_ref[0]                                            # (N_PATCH, CPP) f32
    emb = jnp.dot(_bf16(patches), w_ref[...],
                  preferred_element_type=jnp.float32) + b_ref[...]
    pad = jnp.zeros((SEQ_PAD - SEQ, EMBED), jnp.float32)
    tok = jnp.concatenate([cls_ref[...], emb, pad], axis=0)        # (SEQ_PAD, EMBED)
    o_ref[0] = tok + pos_ref[...]


def embed(patches, patch_w, patch_b, cls, pos_pad):
    B = patches.shape[0]
    return pl.pallas_call(
        _embed_kernel,
        grid=(B,),
        in_specs=[
            pl.BlockSpec((1, N_PATCH, CPP), lambda b: (b, 0, 0)),
            pl.BlockSpec((CPP, EMBED), lambda b: (0, 0)),
            pl.BlockSpec((1, EMBED), lambda b: (0, 0)),
            pl.BlockSpec((1, EMBED), lambda b: (0, 0)),
            pl.BlockSpec((SEQ_PAD, EMBED), lambda b: (0, 0)),
        ],
        out_specs=pl.BlockSpec((1, SEQ_PAD, EMBED), lambda b: (b, 0, 0)),
        out_shape=jax.ShapeDtypeStruct((B, SEQ_PAD, EMBED), jnp.float32),
        compiler_params=pltpu.CompilerParams(dimension_semantics=("parallel",)),
    )(patches, patch_w, patch_b, cls, pos_pad)


# ----------------------------- fused transformer block kernel -----------------------------

def _block_kernel(x_ref, ln1_g, ln1_b, qkv_w, qkv_b, proj_w, proj_b,
                  ln2_g, ln2_b, fc1_w, fc1_b, fc2_w, fc2_b, o_ref):
    x = x_ref[0]                                                  # (SEQ_PAD, EMBED) f32

    # ---- multi-head self-attention (pre-norm), all heads fused, lane-dense output ----
    h = _ln(x, ln1_g[...], ln1_b[...])
    qkv = jnp.dot(_bf16(h), qkv_w[...],
                  preferred_element_type=jnp.float32) + qkv_b[...]   # (T, 3D)

    col = lax.broadcasted_iota(jnp.int32, (SEQ_PAD, SEQ_PAD), 1)
    key_mask = col < SEQ                                          # mask padded key columns

    heads = []
    for hd in range(HEADS):
        q = qkv[:, hd * HEAD_DIM:(hd + 1) * HEAD_DIM]
        k = qkv[:, EMBED + hd * HEAD_DIM:EMBED + (hd + 1) * HEAD_DIM]
        v = qkv[:, 2 * EMBED + hd * HEAD_DIM:2 * EMBED + (hd + 1) * HEAD_DIM]
        # contract last dims -> no explicit transpose of K
        s = lax.dot_general(_bf16(q), _bf16(k), (((1,), (1,)), ((), ())),
                            preferred_element_type=jnp.float32) * ATTN_SCALE
        s = jnp.where(key_mask, s, -1e30)
        s = s - jnp.max(s, axis=-1, keepdims=True)
        p = jnp.exp(s)
        p = p * pl.reciprocal(jnp.sum(p, axis=-1, keepdims=True), approx=True)
        heads.append(jnp.dot(_bf16(p), _bf16(v), preferred_element_type=jnp.float32))
    attn = jnp.concatenate(heads, axis=-1)                        # (T, EMBED), lane-dense

    proj = jnp.dot(_bf16(attn), proj_w[...],
                   preferred_element_type=jnp.float32) + proj_b[...]
    x = x + proj                                                  # residual 1 (fused)

    # ---- MLP (pre-norm, exact-erf GELU) ----
    h2 = _ln(x, ln2_g[...], ln2_b[...])
    m = jnp.dot(_bf16(h2), fc1_w[...],
                preferred_element_type=jnp.float32) + fc1_b[...]
    m = _gelu(m)
    m = jnp.dot(_bf16(m), fc2_w[...],
                preferred_element_type=jnp.float32) + fc2_b[...]
    o_ref[0] = (x + m).astype(o_ref.dtype)                        # residual 2 (fused)


def transformer_block(x, blk):
    B = x.shape[0]

    def full2d(shape):
        return pl.BlockSpec(shape, lambda b: (0, 0))

    return pl.pallas_call(
        _block_kernel,
        grid=(B,),
        in_specs=[
            pl.BlockSpec((1, SEQ_PAD, EMBED), lambda b: (b, 0, 0)),
            full2d((1, EMBED)), full2d((1, EMBED)),
            full2d((EMBED, 3 * EMBED)), full2d((1, 3 * EMBED)),
            full2d((EMBED, EMBED)), full2d((1, EMBED)),
            full2d((1, EMBED)), full2d((1, EMBED)),
            full2d((EMBED, MLP)), full2d((1, MLP)),
            full2d((MLP, EMBED)), full2d((1, EMBED)),
        ],
        out_specs=pl.BlockSpec((1, SEQ_PAD, EMBED), lambda b: (b, 0, 0)),
        out_shape=jax.ShapeDtypeStruct((B, SEQ_PAD, EMBED), jnp.float32),
        compiler_params=pltpu.CompilerParams(dimension_semantics=("parallel",)),
    )(x,
      blk["ln1_g"], blk["ln1_b"], blk["qkv_w"], blk["qkv_b"],
      blk["proj_w"], blk["proj_b"], blk["ln2_g"], blk["ln2_b"],
      blk["fc1_w"], blk["fc1_b"], blk["fc2_w"], blk["fc2_b"])


# ----------------------------- final LayerNorm + cls-token extract -----------------------------

def _final_kernel(x_ref, g_ref, b_ref, o_ref):
    cls_tok = x_ref[0][0:1, :]                                    # (1, EMBED)
    o_ref[0] = _ln(cls_tok, g_ref[...], b_ref[...]).astype(o_ref.dtype)


def final_norm_cls(x, g, b):
    B = x.shape[0]
    out = pl.pallas_call(
        _final_kernel,
        grid=(B,),
        in_specs=[
            pl.BlockSpec((1, SEQ_PAD, EMBED), lambda b: (b, 0, 0)),
            pl.BlockSpec((1, EMBED), lambda b: (0, 0)),
            pl.BlockSpec((1, EMBED), lambda b: (0, 0)),
        ],
        out_specs=pl.BlockSpec((1, 1, EMBED), lambda b: (b, 0, 0)),
        out_shape=jax.ShapeDtypeStruct((B, 1, EMBED), jnp.float32),
        compiler_params=pltpu.CompilerParams(dimension_semantics=("parallel",)),
    )(x, g, b)
    return out.reshape(B, EMBED)


# ----------------------------- parameters -----------------------------

def init_params(key):
    ks = jax.random.split(key, 3 + DEPTH)

    def normal(k, shape, std=0.02):
        return std * jax.random.normal(k, shape, dtype=jnp.float32)

    params = {
        # conv patch-embed weight (D, C, P, P) flattened as matmul weight (C*P*P, D)
        "patch_w": normal(ks[0], (CPP, EMBED)),
        "patch_b": jnp.zeros((EMBED,), jnp.float32),
        "cls": normal(ks[1], (1, 1, EMBED)),
        "pos": normal(ks[2], (1, SEQ, EMBED)),
        "norm_g": jnp.ones((EMBED,), jnp.float32),
        "norm_b": jnp.zeros((EMBED,), jnp.float32),
        "blocks": [],
    }
    for d in range(DEPTH):
        bk = jax.random.split(ks[3 + d], 4)
        params["blocks"].append({
            "ln1_g": jnp.ones((EMBED,), jnp.float32),
            "ln1_b": jnp.zeros((EMBED,), jnp.float32),
            "qkv_w": normal(bk[0], (EMBED, 3 * EMBED)),
            "qkv_b": jnp.zeros((3 * EMBED,), jnp.float32),
            "proj_w": normal(bk[1], (EMBED, EMBED)),
            "proj_b": jnp.zeros((EMBED,), jnp.float32),
            "ln2_g": jnp.ones((EMBED,), jnp.float32),
            "ln2_b": jnp.zeros((EMBED,), jnp.float32),
            "fc1_w": normal(bk[2], (EMBED, MLP)),
            "fc1_b": jnp.zeros((MLP,), jnp.float32),
            "fc2_w": normal(bk[3], (MLP, EMBED)),
            "fc2_b": jnp.zeros((EMBED,), jnp.float32),
        })
    return params


# ----------------------------- forward pass -----------------------------

def vit_forward(images, params):
    B, C, H, W = images.shape
    gh, gw = H // PATCH, W // PATCH

    # patchify NCHW -> (B, N, C*P*P); per-patch flatten order (C, P, P) matches conv-weight flatten
    patches = images.reshape(B, C, gh, PATCH, gw, PATCH)
    patches = patches.transpose(0, 2, 4, 1, 3, 5).reshape(B, gh * gw, CPP)

    # positional embedding padded with zeros up to SEQ_PAD (pad rows carry no signal)
    pos_pad = jnp.zeros((SEQ_PAD, EMBED), jnp.float32).at[:SEQ].set(params["pos"][0])

    # patch embed + cls prepend + pos add + pad, fused in one kernel (bf16 weights at the MXU)
    x = embed(patches,
              params["patch_w"].astype(jnp.bfloat16),
              params["patch_b"].reshape(1, EMBED),
              params["cls"].reshape(1, EMBED),
              pos_pad)

    for blk in params["blocks"]:
        x = transformer_block(x, {
            "ln1_g": blk["ln1_g"].reshape(1, EMBED),
            "ln1_b": blk["ln1_b"].reshape(1, EMBED),
            "qkv_w": blk["qkv_w"].astype(jnp.bfloat16),
            "qkv_b": blk["qkv_b"].reshape(1, 3 * EMBED),
            "proj_w": blk["proj_w"].astype(jnp.bfloat16),
            "proj_b": blk["proj_b"].reshape(1, EMBED),
            "ln2_g": blk["ln2_g"].reshape(1, EMBED),
            "ln2_b": blk["ln2_b"].reshape(1, EMBED),
            "fc1_w": blk["fc1_w"].astype(jnp.bfloat16),
            "fc1_b": blk["fc1_b"].reshape(1, MLP),
            "fc2_w": blk["fc2_w"].astype(jnp.bfloat16),
            "fc2_b": blk["fc2_b"].reshape(1, EMBED),
        })

    # final LayerNorm on the cls token; model.head = Identity
    return final_norm_cls(x,
                          params["norm_g"].reshape(1, EMBED),
                          params["norm_b"].reshape(1, EMBED))


if __name__ == "__main__":
    key = jax.random.PRNGKey(0)
    pkey, xkey = jax.random.split(key)
    params = init_params(pkey)
    images = jax.random.normal(xkey, (2, IN_CH, IMG, IMG), dtype=jnp.float32)

    feats = jax.jit(vit_forward)(images, params)
    feats = jax.block_until_ready(feats)
    assert feats.shape == (2, EMBED)
    assert bool(jnp.all(jnp.isfinite(feats)))
    print("KERNEL_OK")
</pallas_src>

<mosaic_0001>
module attributes {stable_mosaic.version = 11 : i64} {
  func.func @_embed_kernel(%arg0: i32, %arg1: memref<1x16x192xf32, #tpu.memory_space<vmem>>, %arg2: memref<192x64xbf16, #tpu.memory_space<vmem>>, %arg3: memref<1x64xf32, #tpu.memory_space<vmem>>, %arg4: memref<1x64xf32, #tpu.memory_space<vmem>>, %arg5: memref<24x64xf32, #tpu.memory_space<vmem>>, %arg6: memref<1x24x64xf32, #tpu.memory_space<vmem>>) attributes {dimension_semantics = [#tpu.dimension_semantics<parallel>], iteration_bounds = array<i64: 2>, scalar_prefetch = 0 : i64, scratch_operands = 0 : i64, tpu.core_type = #tpu.core_type<tc>, window_params = [{transform_indices = @transform_0, window_bounds = array<i64: 1, 16, 192>}, {pipeline_mode = #tpu.pipeline_mode<synchronous>, transform_indices = @transform_1, window_bounds = array<i64: 192, 64>}, {pipeline_mode = #tpu.pipeline_mode<synchronous>, transform_indices = @transform_2, window_bounds = array<i64: 1, 64>}, {pipeline_mode = #tpu.pipeline_mode<synchronous>, transform_indices = @transform_3, window_bounds = array<i64: 1, 64>}, {pipeline_mode = #tpu.pipeline_mode<synchronous>, transform_indices = @transform_4, window_bounds = array<i64: 24, 64>}, {transform_indices = @transform_5, window_bounds = array<i64: 1, 24, 64>}]} {
    %c0 = arith.constant 0 : index
    %c0_0 = arith.constant 0 : index
    %c0_1 = arith.constant 0 : index
    %0 = vector.load %arg1[%c0, %c0_0, %c0_1] : memref<1x16x192xf32, #tpu.memory_space<vmem>>, vector<1x16x192xf32>
    %1 = vector.shape_cast %0 : vector<1x16x192xf32> to vector<16x192xf32>
    %2 = arith.truncf %1 : vector<16x192xf32> to vector<16x192xbf16>
    %c0_2 = arith.constant 0 : index
    %c0_3 = arith.constant 0 : index
    %3 = vector.load %arg2[%c0_2, %c0_3] : memref<192x64xbf16, #tpu.memory_space<vmem>>, vector<192x64xbf16>
    %cst = arith.constant dense<0.000000e+00> : vector<16x64xf32>
    %4 = tpu.matmul %2, %3, %cst {dimension_numbers = #tpu.dot_dimension_numbers<[1], [0], [0], [1], [0, 0, 1, 1], [], []>} : vector<16x192xbf16>, vector<192x64xbf16>, vector<16x64xf32> -> vector<16x64xf32>
    %c0_4 = arith.constant 0 : index
    %c0_5 = arith.constant 0 : index
    %5 = vector.load %arg3[%c0_4, %c0_5] : memref<1x64xf32, #tpu.memory_space<vmem>>, vector<1x64xf32>
    %6 = vector.broadcast %5 : vector<1x64xf32> to vector<16x64xf32>
    %7 = arith.addf %4, %6 : vector<16x64xf32>
    %cst_6 = arith.constant 0.000000e+00 : f32
    %8 = vector.broadcast %cst_6 : f32 to vector<7x64xf32>
    %c0_7 = arith.constant 0 : index
    %c0_8 = arith.constant 0 : index
    %9 = vector.load %arg4[%c0_7, %c0_8] : memref<1x64xf32, #tpu.memory_space<vmem>>, vector<1x64xf32>
    %10 = tpu.concatenate %9, %7, %8 in 0 : vector<1x64xf32>, vector<16x64xf32>, vector<7x64xf32> -> vector<24x64xf32>
    %c0_9 = arith.constant 0 : index
    %c0_10 = arith.constant 0 : index
    %11 = vector.load %arg5[%c0_9, %c0_10] : memref<24x64xf32, #tpu.memory_space<vmem>>, vector<24x64xf32>
    %12 = arith.addf %10, %11 : vector<24x64xf32>
    %c0_11 = arith.constant 0 : index
    %c0_12 = arith.constant 0 : index
    %c0_13 = arith.constant 0 : index
    %13 = vector.load %arg6[%c0_11, %c0_12, %c0_13] : memref<1x24x64xf32, #tpu.memory_space<vmem>>, vector<1x24x64xf32>
    %14 = vector.shape_cast %13 : vector<1x24x64xf32> to vector<24x64xf32>
    %15 = vector.shape_cast %12 : vector<24x64xf32> to vector<1x24x64xf32>
    tpu.vector_store %arg6[%c0_11, %c0_12, %c0_13], %15 {strides = array<i32>} : memref<1x24x64xf32, #tpu.memory_space<vmem>>, vector<1x24x64xf32>,
    return
  }
  func.func @transform_0(%arg0: i32) -> (i32, i32, i32) {
    %c0_i32 = arith.constant 0 : i32
    %c0_i32_0 = arith.constant 0 : i32
    %c0_i32_1 = arith.constant 0 : i32
    return %arg0, %c0_i32, %c0_i32_0 : i32, i32, i32
  }
  func.func @transform_1(%arg0: i32) -> (i32, i32) {
    %c0_i32 = arith.constant 0 : i32
    %c0_i32_0 = arith.constant 0 : i32
    %c0_i32_1 = arith.constant 0 : i32
    return %c0_i32, %c0_i32_0 : i32, i32
  }
  func.func @transform_2(%arg0: i32) -> (i32, i32) {
    %c0_i32 = arith.constant 0 : i32
    %c0_i32_0 = arith.constant 0 : i32
    %c0_i32_1 = arith.constant 0 : i32
    return %c0_i32, %c0_i32_0 : i32, i32
  }
  func.func @transform_3(%arg0: i32) -> (i32, i32) {
    %c0_i32 = arith.constant 0 : i32
    %c0_i32_0 = arith.constant 0 : i32
    %c0_i32_1 = arith.constant 0 : i32
    return %c0_i32, %c0_i32_0 : i32, i32
  }
  func.func @transform_4(%arg0: i32) -> (i32, i32) {
    %c0_i32 = arith.constant 0 : i32
    %c0_i32_0 = arith.constant 0 : i32
    %c0_i32_1 = arith.constant 0 : i32
    return %c0_i32, %c0_i32_0 : i32, i32
  }
  func.func @transform_5(%arg0: i32) -> (i32, i32, i32) {
    %c0_i32 = arith.constant 0 : i32
    %c0_i32_0 = arith.constant 0 : i32
    %c0_i32_1 = arith.constant 0 : i32
    return %arg0, %c0_i32, %c0_i32_0 : i32, i32, i32
  }
}

module attributes {stable_mosaic.version = 11 : i64} {
  func.func @_block_kernel(%arg0: i32, %arg1: memref<1x24x64xf32, #tpu.memory_space<vmem>>, %arg2: memref<1x64xf32, #tpu.memory_space<vmem>>, %arg3: memref<1x64xf32, #tpu.memory_space<vmem>>, %arg4: memref<64x192xbf16, #tpu.memory_space<vmem>>, %arg5: memref<1x192xf32, #tpu.memory_space<vmem>>, %arg6: memref<64x64xbf16, #tpu.memory_space<vmem>>, %arg7: memref<1x64xf32, #tpu.memory_space<vmem>>, %arg8: memref<1x64xf32, #tpu.memory_space<vmem>>, %arg9: memref<1x64xf32, #tpu.memory_space<vmem>>, %arg10: memref<64x256xbf16, #tpu.memory_space<vmem>>, %arg11: memref<1x256xf32, #tpu.memory_space<vmem>>, %arg12: memref<256x64xbf16, #tpu.memory_space<vmem>>, %arg13: memref<1x64xf32, #tpu.memory_space<vmem>>, %arg14: memref<1x24x64xf32, #tpu.memory_space<vmem>>) attributes {dimension_semantics = [#tpu.dimension_semantics<parallel>], iteration_bounds = array<i64: 2>, scalar_prefetch = 0 : i64, scratch_operands = 0 : i64, tpu.core_type = #tpu.core_type<tc>, window_params = [{transform_indices = @transform_0, window_bounds = array<i64: 1, 24, 64>}, {pipeline_mode = #tpu.pipeline_mode<synchronous>, transform_indices = @transform_1, window_bounds = array<i64: 1, 64>}, {pipeline_mode = #tpu.pipeline_mode<synchronous>, transform_indices = @transform_2, window_bounds = array<i64: 1, 64>}, {pipeline_mode = #tpu.pipeline_mode<synchronous>, transform_indices = @transform_3, window_bounds = array<i64: 64, 192>}, {pipeline_mode = #tpu.pipeline_mode<synchronous>, transform_indices = @transform_4, window_bounds = array<i64: 1, 192>}, {pipeline_mode = #tpu.pipeline_mode<synchronous>, transform_indices = @transform_5, window_bounds = array<i64: 64, 64>}, {pipeline_mode = #tpu.pipeline_mode<synchronous>, transform_indices = @transform_6, window_bounds = array<i64: 1, 64>}, {pipeline_mode = #tpu.pipeline_mode<synchronous>, transform_indices = @transform_7, window_bounds = array<i64: 1, 64>}, {pipeline_mode = #tpu.pipeline_mode<synchronous>, transform_indices = @transform_8, window_bounds = array<i64: 1, 64>}, {pipeline_mode = #tpu.pipeline_mode<synchronous>, transform_indices = @transform_9, window_bounds = array<i64: 64, 256>}, {pipeline_mode = #tpu.pipeline_mode<synchronous>, transform_indices = @transform_10, window_bounds = array<i64: 1, 256>}, {pipeline_mode = #tpu.pipeline_mode<synchronous>, transform_indices = @transform_11, window_bounds = array<i64: 256, 64>}, {pipeline_mode = #tpu.pipeline_mode<synchronous>, transform_indices = @transform_12, window_bounds = array<i64: 1, 64>}, {transform_indices = @transform_13, window_bounds = array<i64: 1, 24, 64>}]} {
    %c0 = arith.constant 0 : index
    %c0_0 = arith.constant 0 : index
    %c0_1 = arith.constant 0 : index
    %0 = vector.load %arg1[%c0, %c0_0, %c0_1] : memref<1x24x64xf32, #tpu.memory_space<vmem>>, vector<1x24x64xf32>
    %1 = vector.shape_cast %0 : vector<1x24x64xf32> to vector<24x64xf32>
    %c0_2 = arith.constant 0 : index
    %c0_3 = arith.constant 0 : index
    %2 = vector.load %arg2[%c0_2, %c0_3] : memref<1x64xf32, #tpu.memory_space<vmem>>, vector<1x64xf32>
    %c0_4 = arith.constant 0 : index
    %c0_5 = arith.constant 0 : index
    %3 = vector.load %arg3[%c0_4, %c0_5] : memref<1x64xf32, #tpu.memory_space<vmem>>, vector<1x64xf32>
    %cst = arith.constant dense<0.000000e+00> : vector<24xf32>
    %4 = vector.multi_reduction <add>, %1, %cst [1] : vector<24x64xf32> to vector<24xf32>
    %5 = vector.shape_cast %4 : vector<24xf32> to vector<24x1xf32>
    %cst_6 = arith.constant 6.400000e+01 : f32
    %6 = vector.broadcast %cst_6 : f32 to vector<24x1xf32>
    %7 = arith.divf %5, %6 : vector<24x1xf32>
    %8 = vector.broadcast %7 : vector<24x1xf32> to vector<24x64xf32>
    %9 = arith.subf %1, %8 : vector<24x64xf32>
    %10 = arith.mulf %9, %9 : vector<24x64xf32>
    %cst_7 = arith.constant dense<0.000000e+00> : vector<24xf32>
    %11 = vector.multi_reduction <add>, %10, %cst_7 [1] : vector<24x64xf32> to vector<24xf32>
    %12 = vector.shape_cast %11 : vector<24xf32> to vector<24x1xf32>
    %cst_8 = arith.constant 6.400000e+01 : f32
    %13 = vector.broadcast %cst_8 : f32 to vector<24x1xf32>
    %14 = arith.divf %12, %13 : vector<24x1xf32>
    %cst_9 = arith.constant 9.99999997E-7 : f32
    %15 = vector.broadcast %cst_9 : f32 to vector<24x1xf32>
    %16 = arith.addf %14, %15 : vector<24x1xf32>
    %17 = math.rsqrt %16 : vector<24x1xf32>
    %18 = vector.broadcast %17 : vector<24x1xf32> to vector<24x64xf32>
    %19 = arith.mulf %9, %18 : vector<24x64xf32>
    %20 = vector.broadcast %2 : vector<1x64xf32> to vector<24x64xf32>
    %21 = arith.mulf %19, %20 : vector<24x64xf32>
    %22 = vector.broadcast %3 : vector<1x64xf32> to vector<24x64xf32>
    %23 = arith.addf %21, %22 : vector<24x64xf32>
    %24 = arith.truncf %23 : vector<24x64xf32> to vector<24x64xbf16>
    %c0_10 = arith.constant 0 : index
    %c0_11 = arith.constant 0 : index
    %25 = vector.load %arg4[%c0_10, %c0_11] : memref<64x192xbf16, #tpu.memory_space<vmem>>, vector<64x192xbf16>
    %cst_12 = arith.constant dense<0.000000e+00> : vector<24x192xf32>
    %26 = tpu.matmul %24, %25, %cst_12 {dimension_numbers = #tpu.dot_dimension_numbers<[1], [0], [0], [1], [0, 0, 1, 1], [], []>} : vector<24x64xbf16>, vector<64x192xbf16>, vector<24x192xf32> -> vector<24x192xf32>
    %c0_13 = arith.constant 0 : index
    %c0_14 = arith.constant 0 : index
    %27 = vector.load %arg5[%c0_13, %c0_14] : memref<1x192xf32, #tpu.memory_space<vmem>>, vector<1x192xf32>
    %28 = vector.broadcast %27 : vector<1x192xf32> to vector<24x192xf32>
    %29 = arith.addf %26, %28 : vector<24x192xf32>
    %30 = tpu.iota {dimensions = array<i32: 1>} : vector<24x24xi32>
    %c17_i32 = arith.constant 17 : i32
    %31 = vector.broadcast %c17_i32 : i32 to vector<24x24xi32>
    %32 = arith.cmpi slt, %30, %31 : vector<24x24xi32>
    %33 = vector.extract_strided_slice %29 {offsets = [0, 0], sizes = [24, 16], strides = [1, 1]} : vector<24x192xf32> to vector<24x16xf32>
    %34 = vector.extract_strided_slice %29 {offsets = [0, 64], sizes = [24, 16], strides = [1, 1]} : vector<24x192xf32> to vector<24x16xf32>
    %35 = vector.extract_strided_slice %29 {offsets = [0, 128], sizes = [24, 16], strides = [1, 1]} : vector<24x192xf32> to vector<24x16xf32>
    %36 = arith.truncf %33 : vector<24x16xf32> to vector<24x16xbf16>
    %37 = arith.truncf %34 : vector<24x16xf32> to vector<24x16xbf16>
    %cst_15 = arith.constant dense<0.000000e+00> : vector<24x24xf32>
    %38 = tpu.matmul %36, %37, %cst_15 {dimension_numbers = #tpu.dot_dimension_numbers<[1], [1], [0], [0], [0, 0, 1, 0], [], []>} : vector<24x16xbf16>, vector<24x16xbf16>, vector<24x24xf32> -> vector<24x24xf32>
    %cst_16 = arith.constant 2.500000e-01 : f32
    %39 = vector.broadcast %cst_16 : f32 to vector<24x24xf32>
    %40 = arith.mulf %38, %39 : vector<24x24xf32>
    %cst_17 = arith.constant -1.000000e+30 : f32
    %41 = vector.broadcast %cst_17 : f32 to vector<24x24xf32>
    %42 = arith.select %32, %40, %41 : vector<24x24xi1>, vector<24x24xf32>
    %cst_18 = arith.constant dense<0xFF800000> : vector<24xf32>
    %43 = vector.multi_reduction <maximumf>, %42, %cst_18 [1] : vector<24x24xf32> to vector<24xf32>
    %44 = vector.shape_cast %43 : vector<24xf32> to vector<24x1xf32>
    %45 = vector.broadcast %44 : vector<24x1xf32> to vector<24x24xf32>
    %46 = arith.subf %42, %45 : vector<24x24xf32>
    %47 = math.exp %46 : vector<24x24xf32>
    %cst_19 = arith.constant dense<0.000000e+00> : vector<24xf32>
    %48 = vector.multi_reduction <add>, %47, %cst_19 [1] : vector<24x24xf32> to vector<24xf32>
    %49 = vector.shape_cast %48 : vector<24xf32> to vector<24x1xf32>
    %50 = tpu.reciprocal %49 {approx = true} : vector<24x1xf32> -> vector<24x1xf32>
    %51 = vector.broadcast %50 : vector<24x1xf32> to vector<24x24xf32>
    %52 = arith.mulf %47, %51 : vector<24x24xf32>
    %53 = arith.truncf %52 : vector<24x24xf32> to vector<24x24xbf16>
    %54 = arith.truncf %35 : vector<24x16xf32> to vector<24x16xbf16>
    %cst_20 = arith.constant dense<0.000000e+00> : vector<24x16xf32>
    %55 = tpu.matmul %53, %54, %cst_20 {dimension_numbers = #tpu.dot_dimension_numbers<[1], [0], [0], [1], [0, 0, 1, 1], [], []>} : vector<24x24xbf16>, vector<24x16xbf16>, vector<24x16xf32> -> vector<24x16xf32>
    %56 = vector.extract_strided_slice %29 {offsets = [0, 16], sizes = [24, 16], strides = [1, 1]} : vector<24x192xf32> to vector<24x16xf32>
    %57 = vector.extract_strided_slice %29 {offsets = [0, 80], sizes = [24, 16], strides = [1, 1]} : vector<24x192xf32> to vector<24x16xf32>
    %58 = vector.extract_strided_slice %29 {offsets = [0, 144], sizes = [24, 16], strides = [1, 1]} : vector<24x192xf32> to vector<24x16xf32>
    %59 = arith.truncf %56 : vector<24x16xf32> to vector<24x16xbf16>
    %60 = arith.truncf %57 : vector<24x16xf32> to vector<24x16xbf16>
    %cst_21 = arith.constant dense<0.000000e+00> : vector<24x24xf32>
    %61 = tpu.matmul %59, %60, %cst_21 {dimension_numbers = #tpu.dot_dimension_numbers<[1], [1], [0], [0], [0, 0, 1, 0], [], []>} : vector<24x16xbf16>, vector<24x16xbf16>, vector<24x24xf32> -> vector<24x24xf32>
    %cst_22 = arith.constant 2.500000e-01 : f32
    %62 = vector.broadcast %cst_22 : f32 to vector<24x24xf32>
    %63 = arith.mulf %61, %62 : vector<24x24xf32>
    %cst_23 = arith.constant -1.000000e+30 : f32
    %64 = vector.broadcast %cst_23 : f32 to vector<24x24xf32>
    %65 = arith.select %32, %63, %64 : vector<24x24xi1>, vector<24x24xf32>
    %cst_24 = arith.constant dense<0xFF800000> : vector<24xf32>
    %66 = vector.multi_reduction <maximumf>, %65, %cst_24 [1] : vector<24x24xf32> to vector<24xf32>
    %67 = vector.shape_cast %66 : vector<24xf32> to vector<24x1xf32>
    %68 = vector.broadcast %67 : vector<24x1xf32> to vector<24x24xf32>
    %69 = arith.subf %65, %68 : vector<24x24xf32>
    %70 = math.exp %69 : vector<24x24xf32>
    %cst_25 = arith.constant dense<0.000000e+00> : vector<24xf32>
    %71 = vector.multi_reduction <add>, %70, %cst_25 [1] : vector<24x24xf32> to vector<24xf32>
    %72 = vector.shape_cast %71 : vector<24xf32> to vector<24x1xf32>
    %73 = tpu.reciprocal %72 {approx = true} : vector<24x1xf32> -> vector<24x1xf32>
    %74 = vector.broadcast %73 : vector<24x1xf32> to vector<24x24xf32>
    %75 = arith.mulf %70, %74 : vector<24x24xf32>
    %76 = arith.truncf %75 : vector<24x24xf32> to vector<24x24xbf16>
    %77 = arith.truncf %58 : vector<24x16xf32> to vector<24x16xbf16>
    %cst_26 = arith.constant dense<0.000000e+00> : vector<24x16xf32>
    %78 = tpu.matmul %76, %77, %cst_26 {dimension_numbers = #tpu.dot_dimension_numbers<[1], [0], [0], [1], [0, 0, 1, 1], [], []>} : vector<24x24xbf16>, vector<24x16xbf16>, vector<24x16xf32> -> vector<24x16xf32>
    %79 = vector.extract_strided_slice %29 {offsets = [0, 32], sizes = [24, 16], strides = [1, 1]} : vector<24x192xf32> to vector<24x16xf32>
    %80 = vector.extract_strided_slice %29 {offsets = [0, 96], sizes = [24, 16], strides = [1, 1]} : vector<24x192xf32> to vector<24x16xf32>
    %81 = vector.extract_strided_slice %29 {offsets = [0, 160], sizes = [24, 16], strides = [1, 1]} : vector<24x192xf32> to vector<24x16xf32>
    %82 = arith.truncf %79 : vector<24x16xf32> to vector<24x16xbf16>
    %83 = arith.truncf %80 : vector<24x16xf32> to vector<24x16xbf16>
    %cst_27 = arith.constant dense<0.000000e+00> : vector<24x24xf32>
    %84 = tpu.matmul %82, %83, %cst_27 {dimension_numbers = #tpu.dot_dimension_numbers<[1], [1], [0], [0], [0, 0, 1, 0], [], []>} : vector<24x16xbf16>, vector<24x16xbf16>, vector<24x24xf32> -> vector<24x24xf32>
    %cst_28 = arith.constant 2.500000e-01 : f32
    %85 = vector.broadcast %cst_28 : f32 to vector<24x24xf32>
    %86 = arith.mulf %84, %85 : vector<24x24xf32>
    %cst_29 = arith.constant -1.000000e+30 : f32
    %87 = vector.broadcast %cst_29 : f32 to vector<24x24xf32>
    %88 = arith.select %32, %86, %87 : vector<24x24xi1>, vector<24x24xf32>
    %cst_30 = arith.constant dense<0xFF800000> : vector<24xf32>
    %89 = vector.multi_reduction <maximumf>, %88, %cst_30 [1] : vector<24x24xf32> to vector<24xf32>
    %90 = vector.shape_cast %89 : vector<24xf32> to vector<24x1xf32>
    %91 = vector.broadcast %90 : vector<24x1xf32> to vector<24x24xf32>
    %92 = arith.subf %88, %91 : vector<24x24xf32>
    %93 = math.exp %92 : vector<24x24xf32>
    %cst_31 = arith.constant dense<0.000000e+00> : vector<24xf32>
    %94 = vector.multi_reduction <add>, %93, %cst_31 [1] : vector<24x24xf32> to vector<24xf32>
    %95 = vector.shape_cast %94 : vector<24xf32> to vector<24x1xf32>
    %96 = tpu.reciprocal %95 {approx = true} : vector<24x1xf32> -> vector<24x1xf32>
    %97 = vector.broadcast %96 : vector<24x1xf32> to vector<24x24xf32>
    %98 = arith.mulf %93, %97 : vector<24x24xf32>
    %99 = arith.truncf %98 : vector<24x24xf32> to vector<24x24xbf16>
    %100 = arith.truncf %81 : vector<24x16xf32> to vector<24x16xbf16>
    %cst_32 = arith.constant dense<0.000000e+00> : vector<24x16xf32>
    %101 = tpu.matmul %99, %100, %cst_32 {dimension_numbers = #tpu.dot_dimension_numbers<[1], [0], [0], [1], [0, 0, 1, 1], [], []>} : vector<24x24xbf16>, vector<24x16xbf16>, vector<24x16xf32> -> vector<24x16xf32>
    %102 = vector.extract_strided_slice %29 {offsets = [0, 48], sizes = [24, 16], strides = [1, 1]} : vector<24x192xf32> to vector<24x16xf32>
    %103 = vector.extract_strided_slice %29 {offsets = [0, 112], sizes = [24, 16], strides = [1, 1]} : vector<24x192xf32> to vector<24x16xf32>
    %104 = vector.extract_strided_slice %29 {offsets = [0, 176], sizes = [24, 16], strides = [1, 1]} : vector<24x192xf32> to vector<24x16xf32>
    %105 = arith.truncf %102 : vector<24x16xf32> to vector<24x16xbf16>
    %106 = arith.truncf %103 : vector<24x16xf32> to vector<24x16xbf16>
    %cst_33 = arith.constant dense<0.000000e+00> : vector<24x24xf32>
    %107 = tpu.matmul %105, %106, %cst_33 {dimension_numbers = #tpu.dot_dimension_numbers<[1], [1], [0], [0], [0, 0, 1, 0], [], []>} : vector<24x16xbf16>, vector<24x16xbf16>, vector<24x24xf32> -> vector<24x24xf32>
    %cst_34 = arith.constant 2.500000e-01 : f32
    %108 = vector.broadcast %cst_34 : f32 to vector<24x24xf32>
    %109 = arith.mulf %107, %108 : vector<24x24xf32>
    %cst_35 = arith.constant -1.000000e+30 : f32
    %110 = vector.broadcast %cst_35 : f32 to vector<24x24xf32>
    %111 = arith.select %32, %109, %110 : vector<24x24xi1>, vector<24x24xf32>
    %cst_36 = arith.constant dense<0xFF800000> : vector<24xf32>
    %112 = vector.multi_reduction <maximumf>, %111, %cst_36 [1] : vector<24x24xf32> to vector<24xf32>
    %113 = vector.shape_cast %112 : vector<24xf32> to vector<24x1xf32>
    %114 = vector.broadcast %113 : vector<24x1xf32> to vector<24x24xf32>
    %115 = arith.subf %111, %114 : vector<24x24xf32>
    %116 = math.exp %115 : vector<24x24xf32>
    %cst_37 = arith.constant dense<0.000000e+00> : vector<24xf32>
    %117 = vector.multi_reduction <add>, %116, %cst_37 [1] : vector<24x24xf32> to vector<24xf32>
    %118 = vector.shape_cast %117 : vector<24xf32> to vector<24x1xf32>
    %119 = tpu.reciprocal %118 {approx = true} : vector<24x1xf32> -> vector<24x1xf32>
    %120 = vector.broadcast %119 : vector<24x1xf32> to vector<24x24xf32>
    %121 = arith.mulf %116, %120 : vector<24x24xf32>
    %122 = arith.truncf %121 : vector<24x24xf32> to vector<24x24xbf16>
    %123 = arith.truncf %104 : vector<24x16xf32> to vector<24x16xbf16>
    %cst_38 = arith.constant dense<0.000000e+00> : vector<24x16xf32>
    %124 = tpu.matmul %122, %123, %cst_38 {dimension_numbers = #tpu.dot_dimension_numbers<[1], [0], [0], [1], [0, 0, 1, 1], [], []>} : vector<24x24xbf16>, vector<24x16xbf16>, vector<24x16xf32> -> vector<24x16xf32>
    %125 = tpu.concatenate %55, %78, %101, %124 in 1 : vector<24x16xf32>, vector<24x16xf32>, vector<24x16xf32>, vector<24x16xf32> -> vector<24x64xf32>
    %126 = arith.truncf %125 : vector<24x64xf32> to vector<24x64xbf16>
    %c0_39 = arith.constant 0 : index
    %c0_40 = arith.constant 0 : index
    %127 = vector.load %arg6[%c0_39, %c0_40] : memref<64x64xbf16, #tpu.memory_space<vmem>>, vector<64x64xbf16>
    %cst_41 = arith.constant dense<0.000000e+00> : vector<24x64xf32>
    %128 = tpu.matmul %126, %127, %cst_41 {dimension_numbers = #tpu.dot_dimension_numbers<[1], [0], [0], [1], [0, 0, 1, 1], [], []>} : vector<24x64xbf16>, vector<64x64xbf16>, vector<24x64xf32> -> vector<24x64xf32>
    %c0_42 = arith.constant 0 : index
    %c0_43 = arith.constant 0 : index
    %129 = vector.load %arg7[%c0_42, %c0_43] : memref<1x64xf32, #tpu.memory_space<vmem>>, vector<1x64xf32>
    %130 = vector.broadcast %129 : vector<1x64xf32> to vector<24x64xf32>
    %131 = arith.addf %128, %130 : vector<24x64xf32>
    %132 = arith.addf %1, %131 : vector<24x64xf32>
    %c0_44 = arith.constant 0 : index
    %c0_45 = arith.constant 0 : index
    %133 = vector.load %arg8[%c0_44, %c0_45] : memref<1x64xf32, #tpu.memory_space<vmem>>, vector<1x64xf32>
    %c0_46 = arith.constant 0 : index
    %c0_47 = arith.constant 0 : index
    %134 = vector.load %arg9[%c0_46, %c0_47] : memref<1x64xf32, #tpu.memory_space<vmem>>, vector<1x64xf32>
    %cst_48 = arith.constant dense<0.000000e+00> : vector<24xf32>
    %135 = vector.multi_reduction <add>, %132, %cst_48 [1] : vector<24x64xf32> to vector<24xf32>
    %136 = vector.shape_cast %135 : vector<24xf32> to vector<24x1xf32>
    %cst_49 = arith.constant 6.400000e+01 : f32
    %137 = vector.broadcast %cst_49 : f32 to vector<24x1xf32>
    %138 = arith.divf %136, %137 : vector<24x1xf32>
    %139 = vector.broadcast %138 : vector<24x1xf32> to vector<24x64xf32>
    %140 = arith.subf %132, %139 : vector<24x64xf32>
    %141 = arith.mulf %140, %140 : vector<24x64xf32>
    %cst_50 = arith.constant dense<0.000000e+00> : vector<24xf32>
    %142 = vector.multi_reduction <add>, %141, %cst_50 [1] : vector<24x64xf32> to vector<24xf32>
    %143 = vector.shape_cast %142 : vector<24xf32> to vector<24x1xf32>
    %cst_51 = arith.constant 6.400000e+01 : f32
    %144 = vector.broadcast %cst_51 : f32 to vector<24x1xf32>
    %145 = arith.divf %143, %144 : vector<24x1xf32>
    %cst_52 = arith.constant 9.99999997E-7 : f32
    %146 = vector.broadcast %cst_52 : f32 to vector<24x1xf32>
    %147 = arith.addf %145, %146 : vector<24x1xf32>
    %148 = math.rsqrt %147 : vector<24x1xf32>
    %149 = vector.broadcast %148 : vector<24x1xf32> to vector<24x64xf32>
    %150 = arith.mulf %140, %149 : vector<24x64xf32>
    %151 = vector.broadcast %133 : vector<1x64xf32> to vector<24x64xf32>
    %152 = arith.mulf %150, %151 : vector<24x64xf32>
    %153 = vector.broadcast %134 : vector<1x64xf32> to vector<24x64xf32>
    %154 = arith.addf %152, %153 : vector<24x64xf32>
    %155 = arith.truncf %154 : vector<24x64xf32> to vector<24x64xbf16>
    %c0_53 = arith.constant 0 : index
    %c0_54 = arith.constant 0 : index
    %156 = vector.load %arg10[%c0_53, %c0_54] : memref<64x256xbf16, #tpu.memory_space<vmem>>, vector<64x256xbf16>
    %cst_55 = arith.constant dense<0.000000e+00> : vector<24x256xf32>
    %157 = tpu.matmul %155, %156, %cst_55 {dimension_numbers = #tpu.dot_dimension_numbers<[1], [0], [0], [1], [0, 0, 1, 1], [], []>} : vector<24x64xbf16>, vector<64x256xbf16>, vector<24x256xf32> -> vector<24x256xf32>
    %c0_56 = arith.constant 0 : index
    %c0_57 = arith.constant 0 : index
    %158 = vector.load %arg11[%c0_56, %c0_57] : memref<1x256xf32, #tpu.memory_space<vmem>>, vector<1x256xf32>
    %159 = vector.broadcast %158 : vector<1x256xf32> to vector<24x256xf32>
    %160 = arith.addf %157, %159 : vector<24x256xf32>
    %cst_58 = arith.constant 5.000000e-01 : f32
    %161 = vector.broadcast %cst_58 : f32 to vector<24x256xf32>
    %162 = arith.mulf %161, %160 : vector<24x256xf32>
    %cst_59 = arith.constant 0.707106769 : f32
    %163 = vector.broadcast %cst_59 : f32 to vector<24x256xf32>
    %164 = arith.mulf %160, %163 : vector<24x256xf32>
    %165 = math.erf %164 : vector<24x256xf32>
    %cst_60 = arith.constant 1.000000e+00 : f32
    %166 = vector.broadcast %cst_60 : f32 to vector<24x256xf32>
    %167 = arith.addf %166, %165 : vector<24x256xf32>
    %168 = arith.mulf %162, %167 : vector<24x256xf32>
    %169 = arith.truncf %168 : vector<24x256xf32> to vector<24x256xbf16>
    %c0_61 = arith.constant 0 : index
    %c0_62 = arith.constant 0 : index
    %170 = vector.load %arg12[%c0_61, %c0_62] : memref<256x64xbf16, #tpu.memory_space<vmem>>, vector<256x64xbf16>
    %cst_63 = arith.constant dense<0.000000e+00> : vector<24x64xf32>
    %171 = tpu.matmul %169, %170, %cst_63 {dimension_numbers = #tpu.dot_dimension_numbers<[1], [0], [0], [1], [0, 0, 1, 1], [], []>} : vector<24x256xbf16>, vector<256x64xbf16>, vector<24x64xf32> -> vector<24x64xf32>
    %c0_64 = arith.constant 0 : index
    %c0_65 = arith.constant 0 : index
    %172 = vector.load %arg13[%c0_64, %c0_65] : memref<1x64xf32, #tpu.memory_space<vmem>>, vector<1x64xf32>
    %173 = vector.broadcast %172 : vector<1x64xf32> to vector<24x64xf32>
    %174 = arith.addf %171, %173 : vector<24x64xf32>
    %175 = arith.addf %132, %174 : vector<24x64xf32>
    %c0_66 = arith.constant 0 : index
    %c0_67 = arith.constant 0 : index
    %c0_68 = arith.constant 0 : index
    %176 = vector.load %arg14[%c0_66, %c0_67, %c0_68] : memref<1x24x64xf32, #tpu.memory_space<vmem>>, vector<1x24x64xf32>
    %177 = vector.shape_cast %176 : vector<1x24x64xf32> to vector<24x64xf32>
    %178 = vector.shape_cast %175 : vector<24x64xf32> to vector<1x24x64xf32>
    tpu.vector_store %arg14[%c0_66, %c0_67, %c0_68], %178 {strides = array<i32>} : memref<1x24x64xf32, #tpu.memory_space<vmem>>, vector<1x24x64xf32>,
    return
  }
  func.func @transform_0(%arg0: i32) -> (i32, i32, i32) {
    %c0_i32 = arith.constant 0 : i32
    %c0_i32_0 = arith.constant 0 : i32
    %c0_i32_1 = arith.constant 0 : i32
    return %arg0, %c0_i32, %c0_i32_0 : i32, i32, i32
  }
  func.func @transform_1(%arg0: i32) -> (i32, i32) {
    %c0_i32 = arith.constant 0 : i32
    %c0_i32_0 = arith.constant 0 : i32
    %c0_i32_1 = arith.constant 0 : i32
    return %c0_i32, %c0_i32_0 : i32, i32
  }
  func.func @transform_2(%arg0: i32) -> (i32, i32) {
    %c0_i32 = arith.constant 0 : i32
    %c0_i32_0 = arith.constant 0 : i32
    %c0_i32_1 = arith.constant 0 : i32
    return %c0_i32, %c0_i32_0 : i32, i32
  }
  func.func @transform_3(%arg0: i32) -> (i32, i32) {
    %c0_i32 = arith.constant 0 : i32
    %c0_i32_0 = arith.constant 0 : i32
    %c0_i32_1 = arith.constant 0 : i32
    return %c0_i32, %c0_i32_0 : i32, i32
  }
  func.func @transform_4(%arg0: i32) -> (i32, i32) {
    %c0_i32 = arith.constant 0 : i32
    %c0_i32_0 = arith.constant 0 : i32
    %c0_i32_1 = arith.constant 0 : i32
    return %c0_i32, %c0_i32_0 : i32, i32
  }
  func.func @transform_5(%arg0: i32) -> (i32, i32) {
    %c0_i32 = arith.constant 0 : i32
    %c0_i32_0 = arith.constant 0 : i32
    %c0_i32_1 = arith.constant 0 : i32
    return %c0_i32, %c0_i32_0 : i32, i32
  }
  func.func @transform_6(%arg0: i32) -> (i32, i32) {
    %c0_i32 = arith.constant 0 : i32
    %c0_i32_0 = arith.constant 0 : i32
    %c0_i32_1 = arith.constant 0 : i32
    return %c0_i32, %c0_i32_0 : i32, i32
  }
  func.func @transform_7(%arg0: i32) -> (i32, i32) {
    %c0_i32 = arith.constant 0 : i32
    %c0_i32_0 = arith.constant 0 : i32
    %c0_i32_1 = arith.constant 0 : i32
    return %c0_i32, %c0_i32_0 : i32, i32
  }
  func.func @transform_8(%arg0: i32) -> (i32, i32) {
    %c0_i32 = arith.constant 0 : i32
    %c0_i32_0 = arith.constant 0 : i32
    %c0_i32_1 = arith.constant 0 : i32
    return %c0_i32, %c0_i32_0 : i32, i32
  }
  func.func @transform_9(%arg0: i32) -> (i32, i32) {
    %c0_i32 = arith.constant 0 : i32
    %c0_i32_0 = arith.constant 0 : i32
    %c0_i32_1 = arith.constant 0 : i32
    return %c0_i32, %c0_i32_0 : i32, i32
  }
  func.func @transform_10(%arg0: i32) -> (i32, i32) {
    %c0_i32 = arith.constant 0 : i32
    %c0_i32_0 = arith.constant 0 : i32
    %c0_i32_1 = arith.constant 0 : i32
    return %c0_i32, %c0_i32_0 : i32, i32
  }
  func.func @transform_11(%arg0: i32) -> (i32, i32) {
    %c0_i32 = arith.constant 0 : i32
    %c0_i32_0 = arith.constant 0 : i32
    %c0_i32_1 = arith.constant 0 : i32
    return %c0_i32, %c0_i32_0 : i32, i32
  }
  func.func @transform_12(%arg0: i32) -> (i32, i32) {
    %c0_i32 = arith.constant 0 : i32
    %c0_i32_0 = arith.constant 0 : i32
    %c0_i32_1 = arith.constant 0 : i32
    return %c0_i32, %c0_i32_0 : i32, i32
  }
  func.func @transform_13(%arg0: i32) -> (i32, i32, i32) {
    %c0_i32 = arith.constant 0 : i32
    %c0_i32_0 = arith.constant 0 : i32
    %c0_i32_1 = arith.constant 0 : i32
    return %arg0, %c0_i32, %c0_i32_0 : i32, i32, i32
  }
}

module attributes {stable_mosaic.version = 11 : i64} {
  func.func @_final_kernel(%arg0: i32, %arg1: memref<1x24x64xf32, #tpu.memory_space<vmem>>, %arg2: memref<1x64xf32, #tpu.memory_space<vmem>>, %arg3: memref<1x64xf32, #tpu.memory_space<vmem>>, %arg4: memref<1x1x64xf32, #tpu.memory_space<vmem>>) attributes {dimension_semantics = [#tpu.dimension_semantics<parallel>], iteration_bounds = array<i64: 2>, scalar_prefetch = 0 : i64, scratch_operands = 0 : i64, tpu.core_type = #tpu.core_type<tc>, window_params = [{transform_indices = @transform_0, window_bounds = array<i64: 1, 24, 64>}, {pipeline_mode = #tpu.pipeline_mode<synchronous>, transform_indices = @transform_1, window_bounds = array<i64: 1, 64>}, {pipeline_mode = #tpu.pipeline_mode<synchronous>, transform_indices = @transform_2, window_bounds = array<i64: 1, 64>}, {transform_indices = @transform_3, window_bounds = array<i64: 1, 1, 64>}]} {
    %c0 = arith.constant 0 : index
    %c0_0 = arith.constant 0 : index
    %c0_1 = arith.constant 0 : index
    %0 = vector.load %arg1[%c0, %c0_0, %c0_1] : memref<1x24x64xf32, #tpu.memory_space<vmem>>, vector<1x24x64xf32>
    %1 = vector.shape_cast %0 : vector<1x24x64xf32> to vector<24x64xf32>
    %2 = vector.extract_strided_slice %1 {offsets = [0, 0], sizes = [1, 64], strides = [1, 1]} : vector<24x64xf32> to vector<1x64xf32>
    %c0_2 = arith.constant 0 : index
    %c0_3 = arith.constant 0 : index
    %3 = vector.load %arg2[%c0_2, %c0_3] : memref<1x64xf32, #tpu.memory_space<vmem>>, vector<1x64xf32>
    %c0_4 = arith.constant 0 : index
    %c0_5 = arith.constant 0 : index
    %4 = vector.load %arg3[%c0_4, %c0_5] : memref<1x64xf32, #tpu.memory_space<vmem>>, vector<1x64xf32>
    %cst = arith.constant dense<0.000000e+00> : vector<1xf32>
    %5 = vector.multi_reduction <add>, %2, %cst [1] : vector<1x64xf32> to vector<1xf32>
    %6 = vector.shape_cast %5 : vector<1xf32> to vector<1x1xf32>
    %cst_6 = arith.constant 6.400000e+01 : f32
    %7 = vector.broadcast %cst_6 : f32 to vector<1x1xf32>
    %8 = arith.divf %6, %7 : vector<1x1xf32>
    %9 = vector.broadcast %8 : vector<1x1xf32> to vector<1x64xf32>
    %10 = arith.subf %2, %9 : vector<1x64xf32>
    %11 = arith.mulf %10, %10 : vector<1x64xf32>
    %cst_7 = arith.constant dense<0.000000e+00> : vector<1xf32>
    %12 = vector.multi_reduction <add>, %11, %cst_7 [1] : vector<1x64xf32> to vector<1xf32>
    %13 = vector.shape_cast %12 : vector<1xf32> to vector<1x1xf32>
    %cst_8 = arith.constant 6.400000e+01 : f32
    %14 = vector.broadcast %cst_8 : f32 to vector<1x1xf32>
    %15 = arith.divf %13, %14 : vector<1x1xf32>
    %cst_9 = arith.constant 9.99999997E-7 : f32
    %16 = vector.broadcast %cst_9 : f32 to vector<1x1xf32>
    %17 = arith.addf %15, %16 : vector<1x1xf32>
    %18 = math.rsqrt %17 : vector<1x1xf32>
    %19 = vector.broadcast %18 : vector<1x1xf32> to vector<1x64xf32>
    %20 = arith.mulf %10, %19 : vector<1x64xf32>
    %21 = arith.mulf %20, %3 : vector<1x64xf32>
    %22 = arith.addf %21, %4 : vector<1x64xf32>
    %c0_10 = arith.constant 0 : index
    %c0_11 = arith.constant 0 : index
    %c0_12 = arith.constant 0 : index
    %23 = vector.load %arg4[%c0_10, %c0_11, %c0_12] : memref<1x1x64xf32, #tpu.memory_space<vmem>>, vector<1x1x64xf32>
    %24 = vector.shape_cast %23 : vector<1x1x64xf32> to vector<1x64xf32>
    %25 = vector.shape_cast %22 : vector<1x64xf32> to vector<1x1x64xf32>
    tpu.vector_store %arg4[%c0_10, %c0_11, %c0_12], %25 {strides = array<i32>} : memref<1x1x64xf32, #tpu.memory_space<vmem>>, vector<1x1x64xf32>,
    return
  }
  func.func @transform_0(%arg0: i32) -> (i32, i32, i32) {
    %c0_i32 = arith.constant 0 : i32
    %c0_i32_0 = arith.constant 0 : i32
    %c0_i32_1 = arith.constant 0 : i32
    return %arg0, %c0_i32, %c0_i32_0 : i32, i32, i32
  }
  func.func @transform_1(%arg0: i32) -> (i32, i32) {
    %c0_i32 = arith.constant 0 : i32
    %c0_i32_0 = arith.constant 0 : i32
    %c0_i32_1 = arith.constant 0 : i32
    return %c0_i32, %c0_i32_0 : i32, i32
  }
  func.func @transform_2(%arg0: i32) -> (i32, i32) {
    %c0_i32 = arith.constant 0 : i32
    %c0_i32_0 = arith.constant 0 : i32
    %c0_i32_1 = arith.constant 0 : i32
    return %c0_i32, %c0_i32_0 : i32, i32
  }
  func.func @transform_3(%arg0: i32) -> (i32, i32, i32) {
    %c0_i32 = arith.constant 0 : i32
    %c0_i32_0 = arith.constant 0 : i32
    %c0_i32_1 = arith.constant 0 : i32
    return %arg0, %c0_i32, %c0_i32_0 : i32, i32, i32
  }
}

</mosaic_0001>

<bundles_post_ra>
// kernel: vit_forward.4
= control target key start
LH: loop header
LB: loop body
LE: loop exit
PB: predicated region body
PF: predicated region fallthrough
CT: control target
= control target key end

     0   :  { %s542_s18 = smov 0   ;;  %s624_s0 = inlined_call_operand.vmem [shape: f32[2,16,192], index: 0, kind: input, shape index: {}]   ;;  %s625_s1 = inlined_call_operand.vmem [shape: bf16[192,64], index: 1, kind: input, shape index: {}]   ;;  %s626_s2 = inlined_call_operand.vmem [shape: f32[1,64], index: 2, kind: input, shape index: {}]   ;;  %s627_s3 = inlined_call_operand.vmem [shape: f32[1,64], index: 3, kind: input, shape index: {}]   ;;  %s628_s4 = inlined_call_operand.vmem [shape: f32[24,64], index: 4, kind: input, shape index: {}]   ;;  %s629_s5 = inlined_call_operand.vmem [shape: f32[2,24,64], index: 5, kind: output, shape index: {}]  }
   0x1 LB: > { %s456_s19 = sadd.s32 4294967295, %s509_s18   ;;  %p460_p0 = scmp.ge.s32.totalorder %s509_s18, 1  ;;  %s509_s18 = sphi %s542_s18, %s15_s18  }
   0x2   : > { %p187_p1 = scmp.lt.s32.totalorder %s509_s18, 3 }
   0x4   : > { %p188_p2 = pnand %p460_p0, %p187_p1 }
   0x5   : > { %v491_v0 = vld [vmem:[%s625_s1] sm:$0xff] (!%p188_p2)   ;;  %v511_v1 = vmov (!%p188_p2), 0   ;;  %p215_p3 = scmp.lt.s32.totalorder (!%p188_p2), %s456_s19, 1  ;;  %v492_v2 = vld [vmem:[%s625_s1 + $0x8] sm:$0xff] (!%p188_p2)   ;;  %v493_v3 = vld [vmem:[%s625_s1 + $0x10] sm:$0xff] (!%p188_p2)   ;;  %vm335_vm0 = vcmask (!%p188_p2), 523264  }
   0x6   : > { %191 = sbr.rel (%p188_p2) target bundleno = 276 (0x114), region = 40  ;;  %339 = vmatprep.subr.bf16.mxu0 (!%p188_p2), %v511_v1  ;;  %v494_v4 = vld [vmem:[%s625_s1 + $0x18] sm:$0xff] (!%p188_p2)   ;;  %v495_v8 = vld [vmem:[%s625_s1 + $0x20] sm:$0xff] (!%p188_p2)   ;;  %v496_v9 = vld [vmem:[%s625_s1 + $0x28] sm:$0xff] (!%p188_p2)   ;;  %vm383_vm1 = vcmask (!%p188_p2), 1040384  }
   0x7   : > { %340 = vmatpush1.bf16.msra.mxu0 (!%p188_p2), %v491_v0  ;;  %v497_v10 = vld [vmem:[%s625_s1 + $0x30] sm:$0xff] (!%p188_p2)   ;;  %v498_v11 = vld [vmem:[%s625_s1 + $0x38] sm:$0xff] (!%p188_p2)   ;;  %v499_v12 = vld [vmem:[%s625_s1 + $0x40] sm:$0xff] (!%p188_p2)  }
   0x8   : > { %341 = vmatprep.subr.bf16.mxu0 (!%p188_p2), %v511_v1  ;;  %v500_v13 = vld [vmem:[%s625_s1 + $0x48] sm:$0xff] (!%p188_p2)   ;;  %v501_v14 = vld [vmem:[%s625_s1 + $0x50] sm:$0xff] (!%p188_p2)   ;;  %v502_v15 = vld [vmem:[%s625_s1 + $0x58] sm:$0xff] (!%p188_p2)  }
   0x9   : > { %v464_v19 = vld [vmem:[%s626_s2] ss:$0 sm:$0xff] (!%p188_p2)  ;;  %v393_v31 = vld [vmem:[%s628_s4 + $0x8] sm:$0xff] (!%p188_p2)  ;;  %v394_v32 = vld [vmem:[%s628_s4 + $0x10] sm:$0xff] (!%p188_p2) }
   0xa   : > { %v380_v24 = vld [vmem:[%s627_s3] sm:$0x1] (!%p188_p2) }
   0xb   : > { %342 = vmatpush1.bf16.msra.mxu0 (!%p188_p2), %v492_v2  ;;  %v392_v27 = vld [vmem:[%s628_s4] sm:$0xff] (!%p188_p2) }
   0xc   : > { %343 = vmatprep.subr.bf16.mxu0 (!%p188_p2), %v511_v1 }
   0xd   : > { %s631_s19 = smov (!%p215_p3, %s456_s19), 1 }
   0xe   : > { %s480_s26 = sshll.u32 %s631_s19, 5  ;;  %s481_s27 = smul.u32 24, %s631_s19 }
   0xf   : > { %s565_s29 = scalar_lea.vmem %s624_s0, %s480_s26  ;;  %344 = vmatpush1.bf16.msra.mxu0 %v493_v3 }
  0x10   : > { %345 = vmatprep.subr.bf16.mxu0 %v511_v1  ;;  %v227_v5 = vld [vmem:[%s565_s29 + $0x8] sm:$0xff]  ;;  %v229_v6 = vld [vmem:[%s565_s29 + $0x18] sm:$0xff]  ;;  %v226_v16 = vld [vmem:[%s565_s29] sm:$0xff]  ;;  %s224_s9 = scalar_lea.vmem %s629_s5, %s481_s27 }
  0x11   : > { %v231_v7 = vpack.c.bf16 %v229_v6, %v227_v5  ;;  %v228_v17 = vld [vmem:[%s565_s29 + $0x10] sm:$0xff] }
  0x12   : > { %v230_v18 = vpack.c.bf16 %v228_v17, %v226_v16 }
  0x13   : > { %346 = vmatpush1.bf16.msra.mxu0 %v494_v4  ;;  %477 = vmatprep.mubr.msk.bf16.mxu0 %vm335_vm0, %v231_v7 }
  0x14   : > { %347 = vmatprep.subr.bf16.mxu0 %v511_v1 }
  0x17   : > { %348 = vmatpush1.bf16.msra.mxu0 %v495_v8 }
  0x18   : > { %349 = vmatprep.subr.bf16.mxu0 %v511_v1 }
  0x1b   : > { %350 = vmatpush1.bf16.msra.mxu0 %v496_v9 }
  0x1c   : > { %351 = vmatprep.subr.bf16.mxu0 %v511_v1 }
  0x1f   : > { %352 = vmatpush1.bf16.msra.mxu0 %v497_v10 }
  0x20   : > { %353 = vmatprep.subr.bf16.mxu0 %v511_v1 }
  0x23   : > { %354 = vmatpush1.bf16.msra.mxu0 %v498_v11 }
  0x24   : > { %355 = vmatprep.subr.bf16.mxu0 %v511_v1 }
  0x27   : > { %356 = vmatpush1.bf16.msra.mxu0 %v499_v12 }
  0x28   : > { %357 = vmatprep.subr.bf16.mxu0 %v511_v1 }
  0x2b   : > { %358 = vmatpush1.bf16.msra.mxu0 %v500_v13 }
  0x2c   : > { %359 = vmatprep.subr.bf16.mxu0 %v511_v1 }
  0x2f   : > { %360 = vmatpush1.bf16.msra.mxu0 %v501_v14 }
  0x30   : > { %361 = vmatprep.subr.bf16.mxu0 %v511_v1 }
  0x33   : > { %362 = vmatpush1.bf16.msra.mxu0 %v502_v15 }
  0x36   : > { %372 = vmatmul.mubr.bf16.vlgmr.msra.gmra.mrb[0].mxu0 %v230_v18 }
 0x109   : > { %v373_v20 = vpop.f32.mrb[0].mxu0 }
 0x10a   : > { %v374_v21 = vadd.f32 %v464_v19, %v373_v20  ;;  %v375_v22 = vpop.f32.mrb[1].mxu0 }
 0x10b   : > { %v376_v23 = vpop.f32.mrb[2].mxu0 }
 0x10c   : > { %v384_v25 = vrot.slane %v374_v21, 7  ;;  %v377_v26 = vadd.f32 %v464_v19, %v376_v23  ;;  %v378_v28 = vpop.f32.mrb[3].mxu0 }
 0x10e   : > { %v385_v29 = vrot.slane %v377_v26, 7  ;;  %v390_v30 = vsel %vm383_vm1, %v380_v24, %v384_v25 }
 0x10f   : > { %v395_v33 = vadd.f32 %v392_v27, %v390_v30 }
 0x110   : > { %v386_v34 = vsel %vm383_vm1, %v384_v25, %v385_v29  ;;  %v391_v35 = vsel %vm383_vm1, %v385_v29, 0.0 }
 0x111   : > { %v396_v36 = vadd.f32 %v393_v31, %v386_v34  ;;  %v397_v37 = vadd.f32 %v394_v32, %v391_v35  ;;  %398 = vst.msk [vmem:[%s224_s9] sm:$0xff] %vm335_vm0, %v395_v33 }
 0x113   : > { %399 = vst.msk [vmem:[%s224_s9 + $0x8] sm:$0xff] %vm335_vm0, %v396_v36  ;;  %400 = vst.msk [vmem:[%s224_s9 + $0x10] sm:$0xff] %vm335_vm0, %v397_v37 }
 0x114 PF: > { %s15_s18 = sadd.s32 1, %s509_s18  }
 0x115   : > { %p12_p4 = scmp.ge.s32.totalorder %s15_s18, 4  }
 0x117   :  { %14 = sbr.rel (!%p12_p4) target bundleno = 1 (0x1), region = 70 }

// kernel: vit_forward.7
= control target key start
LH: loop header
LB: loop body
LE: loop exit
PB: predicated region body
PF: predicated region fallthrough
CT: control target
= control target key end

     0   :  { %8 = vsyncpa [#allocation3], 0  ;;  %s501_s0 = inlined_call_operand.vmem [shape: f32[2,24,64], index: 0, kind: input, shape index: {}]   ;;  %s502_s1 = inlined_call_operand.vmem [shape: f32[1,64], index: 1, kind: input, shape index: {}]   ;;  %s503_s2 = inlined_call_operand.vmem [shape: f32[1,64], index: 2, kind: input, shape index: {}]   ;;  %s504_s3 = inlined_call_operand.hbm [shape: f32[2,1,64], index: 3, kind: output, shape index: {}]  }
   0x1   :  { %10 = vsyncpa [#allocation3 + $0x1], 0  ;;  %s392_s12 = smov 0   ;;  %s394_s13 = smov 0  }
   0x2   :  { %s396_s14 = smov 0   ;;  %s398_s15 = smov 0  }
   0x3 LB: > { %s413_s16 = sadd.s32 4294967295, %s369_s15   ;;  %s257_s17 = sadd.s32 4294967294, %s369_s15   ;;  %s369_s15 = sphi %s398_s15, %s510_s15   ;;  %s365_s14 = sphi %s396_s14, %s509_s14   ;;  %s361_s13 = sphi %s394_s13, %s508_s13   ;;  %s357_s12 = sphi %s392_s12, %s507_s12  }
   0x4   : > { %s417_s18 = sadd.s32 1, %s369_s15   ;;  %s91_s19 = sadd.s32 1, %s365_s14 }
   0x5   : > { %s88_s20 = ssub.s32 %s369_s15, %s417_s18  ;;  %p101_p0 = scmp.ne.s32.totalorder %s365_s14, %s361_s13 }
   0x6   : > { %p89_p1 = scmp.eq.s32.totalorder %s88_s20, 0  ;;  %p102_p2 = scmp.eq.s32.totalorder %s413_s16, 1 }
   0x7   : > { %p107_p3 = scmp.ne.s32.totalorder %s361_s13, %s357_s12  ;;  %p108_p4 = scmp.eq.s32.totalorder %s257_s17, 1 }
   0x8   : > { %s428_s21 = scalar_select %p89_p1, %s365_s14, %s91_s19  }
   0x9   : > { %p430_p5 = por %p102_p2, %p101_p0  ;;  %p434_p6 = por %p108_p4, %p107_p3 }
   0xa   : > { %p260_p7 = scmp.ge.s32.totalorder %s369_s15, 1  ;;  %p140_p8 = scmp.lt.s32.totalorder %s369_s15, 3 }
   0xc   : > { %p141_p9 = pnand %p260_p7, %p140_p8 }
   0xd   : > { %p163_p10 = scmp.lt.s32.totalorder (!%p141_p9), %s413_s16, 1  ;;  %vm171_vm0 = vcmask (!%p141_p9), 516096   ;;  %s161_s29 = sand.u32 (!%p141_p9), 1, %s361_s13   ;;  %v169_v11 = vld [vmem:[%s502_s1] sm:$0x1] (!%p141_p9) }
   0xe   : > { %144 = sbr.rel (%p141_p9) target bundleno = 354 (0x162), region = 32  ;;  %v170_v13 = vld [vmem:[%s503_s2] sm:$0x1] (!%p141_p9)  ;;  %s262_s7 = sshll.u32 (!%p141_p9), %s413_s16, 4 }
   0xf   : > { %s162_s8 = scalar_lea.vmem (!%p141_p9), [#allocation2], %s161_s29  ;;  %s458_s17 = scalar_lea.hbm (!%p141_p9), %s504_s3, %s262_s7 }
  0x10   : > { %s202_s9 = sshll.u32 (!%p141_p9), %s162_s8, 4  ;;  %s190_s19 = scalar_lea.sflag (!%p141_p9), [#allocation3], %s161_s29  ;;  %s460_s9 = int_to_ptr.vmem [resolvable:$true] %s202_s9 }
  0x11   : > { %s307_s20 = scalar_lea.vmem (!%p141_p9), %s460_s9, 16 }
  0x12   : > { %p308_p11 = scmp.ne.s32.totalorder (!%p141_p9), %s460_s9, %s307_s20 }
  0x14   : > { %p309_p12 = pnand (!%p141_p9), %p308_p11, %p430_p5 }
  0x15   : > { %s164_s24 = scalar_select %p163_p10, %s413_s16, 1 }
  0x16   : > { %p310_p13 = pneg %p309_p12  ;;  %s371_s16 = smov [#allocation2]  }
  0x17   : > { %s265_s25 = smul.u32 24, %s164_s24  ;;  %s311_s24 = sshll.u32 %s371_s16, 4  ;;  %s312_s24 = int_to_ptr.vmem [resolvable:$false] %s311_s24 }
  0x18   : > { %p314_p0 = scmp.lt.s32.totalorder %s460_s9, %s312_s24 }
  0x19   : > { %s167_s28 = scalar_lea.vmem %s501_s0, %s265_s25  ;;  %s313_s25 = scalar_lea.vmem %s312_s24, 32 }
  0x1a   : > { %v168_v0 = vld [vmem:[%s167_s28] sm:$0xff]  ;;  %p315_p1 = scmp.lt.s32.totalorder %s313_s25, %s307_s20 }
  0x1b   : > { %v172_v1 = vsel %vm171_vm0, %v168_v0, 0.0 }
  0x1c   : > { %173 = vadd.xlane.f32.xlu0 %v172_v1  ;;  %p316_p2 = por %p315_p1, %p314_p0 }
  0x1e   : > { %p317_p3 = pnand %p316_p2, %p310_p13 }
  0xa9   : > { %v174_v2 = vpop.xlane.xlu0 %173 }
  0xaa   : > { %v176_v3 = vmul.f32 0.015625, %v174_v2 }
  0xac   : > { %v177_v4 = vsub.f32 %v168_v0, %v176_v3 }
  0xae   : > { %v178_v5 = vmul.f32 %v177_v4, %v177_v4 }
  0xb0   : > { %v179_v6 = vsel %vm171_vm0, %v178_v5, 0.0 }
  0xb1   : > { %180 = vadd.xlane.f32.xlu0 %v179_v6 }
 0x13e   : > { %v181_v7 = vpop.xlane.xlu0 %180 }
 0x13f   : > { %v182_v8 = vmul.f32 0.015625, %v181_v7 }
 0x141   : > { %v183_v9 = vadd.f32 1e-06, %v182_v8 }
 0x143   : > { %305 = vrsqrt.f32 %v183_v9 }
 0x14d   : > { %v306_v10 = vpop.eup %305 }
 0x14e   : > { %v185_v12 = vmul.f32 %v306_v10, %v177_v4 }
 0x150   : > { %v186_v14 = vmul.f32 %v185_v12, %v169_v11 }
 0x152   : > { %v187_v15 = vadd.f32 %v186_v14, %v170_v13 }
 0x154   : > { %188 = vst.msk [vmem:[%s162_s8] sm:$0x1] %vm171_vm0, %v187_v15 }
 0x155   : > { %320 = shalt.err (!%p317_p3)
}
 0x156   : > { %s321_s26 = scalar_lea.hbm %s458_s17, 16  ;;  %s325_s29 = scalar_lea.hbm %s504_s3, 32 }
 0x157   : > { %p322_p4 = scmp.ne.s32.totalorder %s458_s17, %s321_s26  ;;  %p326_p9 = scmp.lt.u32.totalorder %s458_s17, %s504_s3 }
 0x158   : > { %p327_p10 = scmp.lt.u32.totalorder %s325_s29, %s321_s26  ;;  %p329_p12 = scmp.lt.u32.totalorder %s321_s26, %s458_s17 }
 0x159   : > { %p323_p7 = pnand %p322_p4, %p430_p5 }
 0x15a   : > { %p328_p11 = por %p327_p10, %p326_p9 }
 0x15b   : > { %p324_p8 = pneg %p323_p7 }
 0x15c   : > { %p330_p13 = por %p329_p12, %p328_p11 }
 0x15e   : > { %p331_p0 = pnand %p330_p13, %p324_p8 }
 0x160   : > { %334 = shalt.err (!%p331_p0)
}
 0x161   : > { %266 = dma.vmem_to_hbm [thread:$0]  (%p430_p5), %s460_s9, 16, %s458_s17, %s190_s19  }
 0x162 PF: > { %p272_p1 = scmp.ge.s32.totalorder %s369_s15, 2  ;;  %s214_s5 = sand.u32 1, %s357_s12  }
 0x163   : > { %s215_s6 = scalar_lea.sflag [#allocation3], %s214_s5 }
 0x164   : > { %p269_p2 = pnand %p272_p1, %p434_p6 }
 0x166   : > { %352 = dma.done.wait (!%p269_p2), %s215_s6, 16  }
 0x167   : > { %354 = vsyncadd (!%p269_p2), %s215_s6, 4294967280  ;;  %p13_p3 = scmp.ge.s32.totalorder %s417_s18, 4   ;;  %s507_s12 = smov %s361_s13 }
 0x168   : > { %s508_s13 = smov %s365_s14  ;;  %s509_s14 = smov %s428_s21 }
 0x169   : > { %s510_s15 = smov %s417_s18  ;;  %15 = sbr.rel (!%p13_p3) target bundleno = 3 (0x3), region = 67 }
 0x170   :  { %219 = vsyncpa [#allocation3], 1 }
 0x171   :  { %221 = vsyncpa [#allocation3 + $0x1], 1 }

// kernel: vit_forward.5
= control target key start
LH: loop header
LB: loop body
LE: loop exit
PB: predicated region body
PF: predicated region fallthrough
CT: control target
= control target key end

     0   :  { %s2379_s25 = smov 0   ;;  %s2790_s0 = inlined_call_operand.vmem [shape: f32[2,24,64], index: 0, kind: input, shape index: {}]   ;;  %s2791_s1 = inlined_call_operand.vmem [shape: f32[1,64], index: 1, kind: input, shape index: {}]   ;;  %s2792_s2 = inlined_call_operand.vmem [shape: f32[1,64], index: 2, kind: input, shape index: {}]   ;;  %s2793_s3 = inlined_call_operand.vmem [shape: bf16[64,192], index: 3, kind: input, shape index: {}]   ;;  %s2794_s4 = inlined_call_operand.vmem [shape: f32[1,192], index: 4, kind: input, shape index: {}]   ;;  %s2795_s5 = inlined_call_operand.vmem [shape: bf16[64,64], index: 5, kind: input, shape index: {}]   ;;  %s2796_s6 = inlined_call_operand.vmem [shape: f32[1,64], index: 6, kind: input, shape index: {}]   ;;  %s2797_s7 = inlined_call_operand.vmem [shape: f32[1,64], index: 7, kind: input, shape index: {}]   ;;  %s2798_s8 = inlined_call_operand.vmem [shape: f32[1,64], index: 8, kind: input, shape index: {}]   ;;  %s2799_s9 = inlined_call_operand.vmem [shape: bf16[64,256], index: 9, kind: input, shape index: {}]   ;;  %s2800_s10 = inlined_call_operand.vmem [shape: f32[1,256], index: 10, kind: input, shape index: {}]   ;;  %s2801_s11 = inlined_call_operand.vmem [shape: bf16[256,64], index: 11, kind: input, shape index: {}]   ;;  %s2802_s12 = inlined_call_operand.vmem [shape: f32[1,64], index: 12, kind: input, shape index: {}]   ;;  %s2803_s13 = inlined_call_operand.vmem [shape: f32[2,24,64], index: 13, kind: output, shape index: {}]  }
   0x1 LB: > { %s1915_s26 = sadd.s32 4294967295, %s2299_s25   ;;  %p1919_p0 = scmp.ge.s32.totalorder %s2299_s25, 1  ;;  %s2299_s25 = sphi %s2379_s25, %s23_s25  }
   0x2   : > { %p387_p1 = scmp.lt.s32.totalorder %s2299_s25, 3 }
   0x4   : > { %p388_p2 = pnand %p1919_p0, %p387_p1 }
   0x5   : > { %p431_p3 = scmp.lt.s32.totalorder (!%p388_p2), %s1915_s26, 1  ;;  %vm447_vm0 = vcmask (!%p388_p2), 523264   ;;  %v2174_v21 = vld [vmem:[%s2793_s3 + $0x4] ss:$8 sps:$4 sm:$0xff] (!%p388_p2)   ;;  %v2176_v22 = vld [vmem:[%s2793_s3] ss:$8 sps:$4 sm:$0xff] (!%p388_p2)   ;;  %v518_v55 = vlaneseq (!%p388_p2) }
   0x6   : > { %391 = sbr.rel (%p388_p2) target bundleno = 3191 (0xc77), region = 72  ;;  %574 = vmatprep.subr.bf16.mxu1 (!%p388_p2), %v2174_v21  ;;  %v2177_v23 = vld [vmem:[%s2793_s3 + $0x14] ss:$8 sps:$4 sm:$0xff] (!%p388_p2)   ;;  %v2179_v24 = vld [vmem:[%s2793_s3 + $0x10] ss:$8 sps:$4 sm:$0xff] (!%p388_p2)   ;;  %v2301_v29 = vmov (!%p388_p2), 0  }
   0x7   : > { %575 = vmatpush1.bf16.msra.mxu1 (!%p388_p2), %v2176_v22  ;;  %v2180_v25 = vld [vmem:[%s2793_s3 + $0x24] ss:$8 sps:$4 sm:$0xff] (!%p388_p2)   ;;  %v2182_v26 = vld [vmem:[%s2793_s3 + $0x20] ss:$8 sps:$4 sm:$0xff] (!%p388_p2)   ;;  %v2183_v27 = vld [vmem:[%s2793_s3 + $0x34] ss:$8 sps:$4 sm:$0xff] (!%p388_p2)   ;;  %606 = vmatprep.mubr.bf16.mxu1 (!%p388_p2), %v2301_v29 }
   0x8   : > { %576 = vmatprep.subr.bf16.mxu1 (!%p388_p2), %v2177_v23  ;;  %v2185_v28 = vld [vmem:[%s2793_s3 + $0x30] ss:$8 sps:$4 sm:$0xff] (!%p388_p2)   ;;  %v1922_v41 = vld [vmem:[%s2791_s1] ss:$0 sm:$0xff] (!%p388_p2)  ;;  %v2441_v56 = vshrl.u32 (!%p388_p2), %v518_v55, 7  ;;  %vm636_vm1 = vcmask (!%p388_p2), 130048  }
   0x9   : > { %v1923_v46 = vld [vmem:[%s2792_s2] ss:$0 sm:$0xff] (!%p388_p2)  ;;  %s2302_s23 = smov (!%p388_p2), 48   ;;  %s2303_s24 = smov (!%p388_p2), 64   ;;  %vm747_vm2 = vcmask (!%p388_p2), 1043456   ;;  %vm703_vm4 = vcmask (!%p388_p2), 195584  }
   0xa   : > { %v520_v57 = vsub.s32 (!%p388_p2), 0, %v2441_v56  ;;  %v516_v58 = vld [vmem:[%s2794_s4] sm:$0x3] (!%p388_p2)  ;;  %v524_v59 = vsub.s32 (!%p388_p2), 1, %v2441_v56  ;;  %s2304_s28 = smov (!%p388_p2), 112   ;;  %s2305_s29 = smov (!%p388_p2), 96  }
   0xb   : > { %577 = vmatpush1.bf16.msra.mxu1 (!%p388_p2), %v2179_v24  ;;  %s2306_s14 = smov (!%p388_p2), 32   ;;  %s2307_s15 = smov (!%p388_p2), 16   ;;  %vm1353_vm5 = vcmask (!%p388_p2), 261120   ;;  %vm1357_vm6 = vcmask (!%p388_p2), 392192  }
   0xc   : > { %578 = vmatprep.subr.bf16.mxu1 (!%p388_p2), %v2180_v25  ;;  %v521_v60 = vrot.slane (!%p388_p2), %v516_v58, %v520_v57  ;;  %v525_v62 = vrot.slane (!%p388_p2), %v516_v58, %v524_v59  ;;  %s2308_s16 = smov (!%p388_p2), 80  }
   0xd   : > { %s2805_s26 = smov (!%p431_p3, %s1915_s26), 1 }
   0xe   : > { %s2142_s27 = smul.u32 24, %s2805_s26 }
   0xf   : > { %579 = vmatpush1.bf16.msra.mxu1 %v2182_v26 }
  0x10   : > { %s2395_s30 = scalar_lea.vmem %s2790_s0, %s2142_s27  ;;  %580 = vmatprep.subr.bf16.mxu1 %v2183_v27 }
  0x11   : > { %v442_v0 = vld [vmem:[%s2395_s30] sm:$0xff]  ;;  %v444_v1 = vld [vmem:[%s2395_s30 + $0x10] sm:$0xff]  ;;  %v443_v2 = vld [vmem:[%s2395_s30 + $0x8] sm:$0xff] }
  0x12   : > { %v448_v3 = vsel %vm447_vm0, %v442_v0, 0.0  ;;  %v454_v4 = vsel %vm447_vm0, %v444_v1, 0.0  ;;  %v451_v5 = vsel %vm447_vm0, %v443_v2, 0.0 }
  0x13   : > { %449 = vadd.xlane.f32.xlu0 %v448_v3  ;;  %455 = vadd.xlane.f32.xlu1 %v454_v4 }
  0x14   : > { %581 = vmatpush1.bf16.msra.mxu1 %v2185_v28 }
  0x17   : > { %452 = vadd.xlane.f32.xlu0 %v451_v5 }
  0xa0   : > { %v450_v6 = vpop.xlane.xlu0 %449  ;;  %v456_v7 = vpop.xlane.xlu1 %455 }
  0xa1   : > { %v458_v8 = vmul.f32 0.015625, %v450_v6  ;;  %v460_v9 = vmul.f32 0.015625, %v456_v7 }
  0xa3   : > { %v461_v10 = vsub.f32 %v442_v0, %v458_v8  ;;  %v463_v11 = vsub.f32 %v444_v1, %v460_v9 }
  0xa4   : > { %v453_v12 = vpop.xlane.xlu0 %452 }
  0xa5   : > { %v459_v13 = vmul.f32 0.015625, %v453_v12  ;;  %v464_v14 = vmul.f32 %v461_v10, %v461_v10  ;;  %v466_v15 = vmul.f32 %v463_v11, %v463_v11 }
  0xa7   : > { %v462_v16 = vsub.f32 %v443_v2, %v459_v13  ;;  %v467_v17 = vsel %vm447_vm0, %v464_v14, 0.0  ;;  %v473_v18 = vsel %vm447_vm0, %v466_v15, 0.0 }
  0xa8   : > { %468 = vadd.xlane.f32.xlu1 %v467_v17 }
  0xa9   : > { %v465_v19 = vmul.f32 %v462_v16, %v462_v16 }
  0xab   : > { %v470_v20 = vsel %vm447_vm0, %v465_v19, 0.0 }
  0xac   : > { %474 = vadd.xlane.f32.xlu1 %v473_v18  ;;  %471 = vadd.xlane.f32.xlu0 %v470_v20 }
 0x135   : > { %v469_v30 = vpop.xlane.xlu1 %468 }
 0x136   : > { %v476_v31 = vmul.f32 0.015625, %v469_v30 }
 0x138   : > { %v479_v32 = vadd.f32 1e-06, %v476_v31 }
 0x139   : > { %v475_v33 = vpop.xlane.xlu1 %474  ;;  %v472_v34 = vpop.xlane.xlu0 %471 }
 0x13a   : > { %2218 = vrsqrt.f32 %v479_v32  ;;  %v478_v35 = vmul.f32 0.015625, %v475_v33  ;;  %v477_v36 = vmul.f32 0.015625, %v472_v34  ;;  %v2505_v34 = vand.u32 127, %v518_v55 }
 0x13c   : > { %v481_v37 = vadd.f32 1e-06, %v478_v35  ;;  %v480_v38 = vadd.f32 1e-06, %v477_v36  ;;  %vm627_vm3 = vcmp.lt.s32.totalorder %v2505_v34, 17 }
 0x13e   : > { %2220 = vrsqrt.f32 %v481_v37 }
 0x13f   : > { %2222 = vrsqrt.f32 %v480_v38 }
 0x144   : > { %v2219_v39 = vpop.eup %2218 }
 0x145   : > { %v485_v40 = vmul.f32 %v2219_v39, %v461_v10 }
 0x147   : > { %v494_v45 = vmul.f32 %v1922_v41, %v485_v40 }
 0x148   : > { %v2221_v42 = vpop.eup %2220 }
 0x149   : > { %v2223_v43 = vpop.eup %2222  ;;  %v487_v48 = vmul.f32 %v2221_v42, %v463_v11  ;;  %v503_v49 = vadd.f32 %v1923_v46, %v494_v45 }
 0x14a   : > { %v486_v44 = vmul.f32 %v2223_v43, %v462_v16 }
 0x14b   : > { %v496_v52 = vmul.f32 %v1922_v41, %v487_v48 }
 0x14c   : > { %v495_v47 = vmul.f32 %v1922_v41, %v486_v44 }
 0x14d   : > { %v505_v53 = vadd.f32 %v1923_v46, %v496_v52 }
 0x14e   : > { %v504_v50 = vadd.f32 %v1923_v46, %v495_v47 }
 0x14f   : > { %v507_v54 = vpack.c.bf16 %v505_v53, %v505_v53 }
 0x150   : > { %v506_v51 = vpack.c.bf16 %v504_v50, %v503_v49 }
 0x152   : > { %1932 = vmatmul.mubr.msk.bf16.vlgmr.msra.gmra.mrb[0].mxu1 %vm447_vm0, %v506_v51 }
 0x153   : > { %616 = vmatprep.mubr.bf16.mxu1 %v2301_v29 }
 0x15a   : > { %1933 = vmatmul.mubr.msk.bf16.gmra.mrb[4].mxu1 %vm447_vm0, %v507_v54 }
 0x225   : > { %v608_v61 = vpop.f32.mrb[0].mxu1 }
 0x226   : > { %v610_v63 = vpop.f32.mrb[1].mxu1  ;;  %v609_v1 = vadd.f32 %v608_v61, %v521_v60 }
 0x227   : > { %v612_v0 = vpop.f32.mrb[2].mxu1  ;;  %v611_v4 = vadd.f32 %v610_v63, %v525_v62 }
 0x228   : > { %v613_v2 = vadd.f32 %v612_v0, %v521_v60  ;;  %v614_v3 = vpop.f32.mrb[3].mxu1 }
 0x229   : > { %v615_v5 = vadd.f32 %v614_v3, %v525_v62 }
 0x22a   : > { %v2452_v6 = vpack.c.bf16 %v613_v2, %v609_v1 }
 0x22b   : > { %v2454_v7 = vpack.c.bf16 %v615_v5, %v611_v4 }
 0x22c   : > { %803 = vrot.lane.b32.xlu1 %v2452_v6, %s2302_s23  ;;  %632 = vrot.lane.b32.xlu0 %v2452_v6, %s2303_s24 }
 0x22d   : > { %2058 = vmatprep.mubr.msk.bf16.mxu1 %vm636_vm1, %v2452_v6  ;;  %v618_v8 = vpop.f32.mrb[4].mxu1 }
 0x22e   : > { %v619_v9 = vadd.f32 %v618_v8, %v521_v60  ;;  %v620_v10 = vpop.f32.mrb[5].mxu1 }
 0x22f   : > { %v622_v11 = vpop.f32.mrb[6].mxu1  ;;  %v621_v23 = vadd.f32 %v620_v10, %v525_v62 }
 0x230   : > { %v2461_v12 = vpack.c.bf16 %v619_v9, %v619_v9  ;;  %v623_v13 = vpop.f32.mrb[7].mxu1  ;;  %799 = vrot.lane.b32.xlu0 %v2452_v6, %s2304_s28 }
 0x231   : > { %v2489_v26 = vpack.c.bf16 %v621_v23, %v621_v23 }
 0x232   : > { %634 = vrot.lane.b32.xlu1 %v2461_v12, %s2303_s24 }
 0x233   : > { %v749_v31 = vsel %vm747_vm2, %v2489_v26, 0 }
 0x234   : > { %801 = vrot.lane.b32.xlu0 %v2461_v12, %s2304_s28 }
 0x236   : > { %805 = vrot.lane.b32.xlu1 %v2461_v12, %s2302_s23 }
 0x238   : > { %972 = vrot.lane.b32.xlu0 %v2452_v6, %s2305_s29 }
 0x23a   : > { %976 = vrot.lane.b32.xlu1 %v2452_v6, %s2306_s14 }
 0x23e   : > { %978 = vrot.lane.b32.xlu1 %v2461_v12, %s2306_s14 }
 0x242   : > { %974 = vrot.lane.b32.xlu1 %v2461_v12, %s2305_s29 }
 0x29e   : > { %v804_v14 = vpop.permute.xlu1 %803  ;;  %v633_v15 = vpop.permute.xlu0 %632 }
 0x29f   : > { %v644_v16 = vsel %vm636_vm1, %v633_v15, 0  ;;  %2130 = vmatprep.subr.msk.bf16.mxu1 %vm636_vm1, %v633_v15  ;;  %2133 = vmatprep.subr.msk.bf16.mxu0 %vm636_vm1, %v804_v14  ;;  %v814_v17 = vsel %vm636_vm1, %v804_v14, 0 }
 0x2a0   : > { %2055 = vmatpush3.bf16.xpose.msra.mxu1 %v644_v16  ;;  %2071 = vmatpush3.bf16.xpose.msra.mxu0 %v814_v17 }
 0x2a2   : > { %v800_v18 = vpop.permute.xlu0 %799 }
 0x2a3   : > { %2074 = vmatprep.mubr.msk.bf16.mxu0 %vm636_vm1, %v800_v18 }
 0x2a4   : > { %v635_v19 = vpop.permute.xlu1 %634 }
 0x2a5   : > { %2131 = vmatprep.subr.msk.bf16.mxu1 %vm636_vm1, %v635_v19  ;;  %v647_v20 = vsel %vm636_vm1, %v635_v19, 0 }
 0x2a6   : > { %v802_v24 = vpop.permute.xlu0 %801 }
 0x2a8   : > { %v806_v21 = vpop.permute.xlu1 %805  ;;  %2057 = vmatpush3.bf16.xpose.msra.mxu1 %v647_v20 }
 0x2a9   : > { %2062 = vmatprep.subr.bf16.mxu1 %v2454_v7  ;;  %2134 = vmatprep.subr.msk.bf16.mxu0 %vm636_vm1, %v806_v21  ;;  %v817_v22 = vsel %vm636_vm1, %v806_v21, 0 }
 0x2aa   : > { %2073 = vmatpush3.bf16.xpose.msra.mxu0 %v817_v22  ;;  %v973_v27 = vpop.permute.xlu0 %972 }
 0x2ac   : > { %v977_v25 = vpop.permute.xlu1 %976 }
 0x2ad   : > { %2136 = vmatprep.subr.msk.bf16.mxu0 %vm636_vm1, %v977_v25  ;;  %v987_v28 = vsel %vm636_vm1, %v977_v25, 0 }
 0x2af   : > { %2059 = vmatmul.mubr.msk.bf16.vlgmr.msra.gmra.mrb[8].mxu1 %vm636_vm1, %v2461_v12 }
 0x2b0   : > { %2063 = vmatpush3.bf16.msra.mxu1 %v2454_v7  ;;  %v979_v30 = vpop.permute.xlu1 %978 }
 0x2b1   : > { %2132 = vmatprep.subr.msk.bf16.mxu1 %vm747_vm2, %v2489_v26  ;;  %2075 = vmatmul.mubr.msk.bf16.vlgmr.msra.gmra.mrb[0].mxu0 %vm636_vm1, %v802_v24  ;;  %v990_v32 = vsel %vm636_vm1, %v979_v30, 0 }
 0x2b2   : > { %2087 = vmatpush3.bf16.xpose.msra.mxu0 %v987_v28  ;;  %2090 = vmatprep.mubr.msk.bf16.mxu0 %vm636_vm1, %v973_v27 }
 0x2b3   : > { %2137 = vmatprep.subr.msk.bf16.mxu0 %vm636_vm1, %v979_v30 }
 0x2b4   : > { %2065 = vmatpush3.bf16.msra.mxu1 %v749_v31  ;;  %v975_v33 = vpop.permute.xlu1 %974 }
 0x2ba   : > { %2089 = vmatpush3.bf16.xpose.msra.mxu0 %v990_v32 }
 0x2c1   : > { %2091 = vmatmul.mubr.msk.bf16.vlgmr.msra.gmra.mrb[4].mxu0 %vm636_vm1, %v975_v33 }
 0x382   : > { %v2060_v35 = vpop.f32.mrb[8].mxu1 }
 0x383   : > { %v683_v36 = vpop.f32.mrb[9].mxu1  ;;  %v699_v37 = vmul.f32 0.25, %v2060_v35 }
 0x384   : > { %v697_v38 = vmul.f32 0.25, %v683_v36  ;;  %v2061_v39 = vpop.f32.mrb[10].mxu1  ;;  %v2076_v40 = vpop.f32.mrb[0].mxu0 }
 0x385   : > { %v686_v41 = vpop.f32.mrb[11].mxu1  ;;  %v853_v42 = vpop.f32.mrb[1].mxu0  ;;  %v869_v43 = vmul.f32 0.25, %v2076_v40  ;;  %v702_v51 = vsel %vm627_vm3, %v699_v37, -1e+30 }
 0x386   : > { %v698_v44 = vmul.f32 0.25, %v686_v41  ;;  %v2077_v45 = vpop.f32.mrb[2].mxu0  ;;  %v700_v46 = vsel %vm627_vm3, %v697_v38, -1e+30  ;;  %v867_v49 = vmul.f32 0.25, %v853_v42  ;;  %v710_v54 = vsel %vm703_vm4, %v702_v51, -inf }
 0x387   : > { %v856_v47 = vpop.f32.mrb[3].mxu0  ;;  %v704_v48 = vsel %vm703_vm4, %v700_v46, -inf  ;;  %v872_v53 = vsel %vm627_vm3, %v869_v43, -1e+30 }
 0x388   : > { %705 = vmax.xlane.f32.xlu0 %v704_v48  ;;  %v701_v50 = vsel %vm627_vm3, %v698_v44, -1e+30  ;;  %v868_v55 = vmul.f32 0.25, %v856_v47  ;;  %v870_v58 = vsel %vm627_vm3, %v867_v49, -1e+30  ;;  %v879_v60 = vsel %vm703_vm4, %v872_v53, -inf }
 0x389   : > { %v707_v52 = vsel %vm703_vm4, %v701_v50, -inf  ;;  %v873_v61 = vsel %vm703_vm4, %v870_v58, -inf }
 0x38a   : > { %708 = vmax.xlane.f32.xlu1 %v707_v52  ;;  %v2525_v62 = vsel %vm627_vm3, %v868_v55, -1e+30 }
 0x38b   : > { %v876_v63 = vsel %vm703_vm4, %v2525_v62, -inf }
 0x38c   : > { %711 = vmax.xlane.f32.xlu0 %v710_v54 }
 0x38e   : > { %880 = vmax.xlane.f32.xlu1 %v879_v60 }
 0x390   : > { %874 = vmax.xlane.f32.xlu0 %v873_v61 }
 0x394   : > { %v2092_v0 = vpop.f32.mrb[4].mxu0  ;;  %877 = vmax.xlane.f32.xlu0 %v876_v63 }
 0x395   : > { %v1026_v1 = vpop.f32.mrb[5].mxu0  ;;  %v1042_v2 = vmul.f32 0.25, %v2092_v0 }
 0x396   : > { %v1040_v3 = vmul.f32 0.25, %v1026_v1  ;;  %v2093_v4 = vpop.f32.mrb[6].mxu0 }
 0x397   : > { %v1029_v5 = vpop.f32.mrb[7].mxu0  ;;  %v1045_v13 = vsel %vm627_vm3, %v1042_v2, -1e+30 }
 0x398   : > { %v1041_v8 = vmul.f32 0.25, %v1029_v5  ;;  %v1043_v9 = vsel %vm627_vm3, %v1040_v3, -1e+30  ;;  %v1052_v15 = vsel %vm703_vm4, %v1045_v13, -inf }
 0x399   : > { %v1046_v10 = vsel %vm703_vm4, %v1043_v9, -inf }
 0x39a   : > { %1047 = vmax.xlane.f32.xlu0 %v1046_v10  ;;  %v1044_v11 = vsel %vm627_vm3, %v1041_v8, -1e+30 }
 0x39b   : > { %v1049_v14 = vsel %vm703_vm4, %v1044_v11, -inf }
 0x39c   : > { %1050 = vmax.xlane.f32.xlu1 %v1049_v14 }
 0x39e   : > { %1053 = vmax.xlane.f32.xlu0 %v1052_v15 }
 0x415   : > { %v706_v16 = vpop.xlane.xlu0 %705 }
 0x416   : > { %v713_v17 = vsub.f32 %v700_v46, %v706_v16 }
 0x417   : > { %v709_v18 = vpop.xlane.xlu1 %708 }
 0x418   : > { %v716_v21 = vmul.f32 1.442695, %v713_v17  ;;  %v714_v27 = vsub.f32 %v701_v50, %v709_v18 }
 0x419   : > { %v712_v19 = vpop.xlane.xlu0 %711 }
 0x41a   : > { %v715_v20 = vsub.f32 %v702_v51, %v712_v19  ;;  %v718_v32 = vmul.f32 1.442695, %v714_v27 }
 0x41b   : > { %v881_v22 = vpop.xlane.xlu1 %880 }
 0x41c   : > { %v720_v23 = vmul.f32 1.442695, %v715_v20  ;;  %v884_v24 = vsub.f32 %v872_v53, %v881_v22 }
 0x41d   : > { %v875_v25 = vpop.xlane.xlu0 %874 }
 0x41e   : > { %2224 = vpow2.f32 %v720_v23  ;;  %v889_v28 = vmul.f32 1.442695, %v884_v24  ;;  %v882_v30 = vsub.f32 %v870_v58, %v875_v25 }
 0x41f   : > { %2226 = vpow2.f32 %v716_v21 }
 0x420   : > { %2228 = vpow2.f32 %v889_v28  ;;  %v885_v31 = vmul.f32 1.442695, %v882_v30 }
 0x421   : > { %v878_v44 = vpop.xlane.xlu0 %877 }
 0x422   : > { %2230 = vpow2.f32 %v885_v31  ;;  %v883_v47 = vsub.f32 %v2525_v62, %v878_v44 }
 0x423   : > { %2232 = vpow2.f32 %v718_v32 }
 0x424   : > { %v887_v50 = vmul.f32 1.442695, %v883_v47 }
 0x426   : > { %2234 = vpow2.f32 %v887_v50 }
 0x427   : > { %v1048_v45 = vpop.xlane.xlu0 %1047 }
 0x428   : > { %v2538_v33 = vpop.eup %2224  ;;  %v1055_v53 = vsub.f32 %v1043_v9, %v1048_v45 }
 0x429   : > { %v2540_v35 = vpop.eup %2226  ;;  %v728_v36 = vsel %vm703_vm4, %v2538_v33, 0.0  ;;  %v1051_v46 = vpop.xlane.xlu1 %1050 }
 0x42a   : > { %v2544_v37 = vpop.eup %2228  ;;  %729 = vadd.xlane.f32.xlu1 %v728_v36  ;;  %v722_v40 = vsel %vm703_vm4, %v2540_v35, 0.0  ;;  %v1056_v49 = vsub.f32 %v1044_v11, %v1051_v46  ;;  %v1058_v55 = vmul.f32 1.442695, %v1055_v53 }
 0x42b   : > { %v897_v38 = vsel %vm703_vm4, %v2544_v37, 0.0  ;;  %v1054_v48 = vpop.xlane.xlu0 %1053 }
 0x42c   : > { %v2548_v39 = vpop.eup %2230  ;;  %898 = vadd.xlane.f32.xlu0 %v897_v38  ;;  %v1057_v51 = vsub.f32 %v1045_v13, %v1054_v48  ;;  %v1060_v52 = vmul.f32 1.442695, %v1056_v49 }
 0x42d   : > { %v891_v41 = vsel %vm703_vm4, %v2548_v39, 0.0  ;;  %v2233_v42 = vpop.eup %2232 }
 0x42e   : > { %723 = vadd.xlane.f32.xlu1 %v722_v40  ;;  %v725_v43 = vsel %vm703_vm4, %v2233_v42, 0.0  ;;  %v1062_v54 = vmul.f32 1.442695, %v1057_v51  ;;  %2236 = vpow2.f32 %v1060_v52 }
 0x430   : > { %892 = vadd.xlane.f32.xlu0 %v891_v41  ;;  %2238 = vpow2.f32 %v1062_v54  ;;  %v2235_v58 = vpop.eup %2234 }
 0x431   : > { %2240 = vpow2.f32 %v1058_v55  ;;  %v894_v61 = vsel %vm703_vm4, %v2235_v58, 0.0 }
 0x434   : > { %726 = vadd.xlane.f32.xlu0 %v725_v43 }
 0x438   : > { %v2562_v60 = vpop.eup %2236 }
 0x439   : > { %v1067_v62 = vsel %vm703_vm4, %v2562_v60, 0.0 }
 0x43a   : > { %v2565_v63 = vpop.eup %2238 }
 0x43b   : > { %v1070_v0 = vsel %vm703_vm4, %v2565_v63, 0.0  ;;  %v2571_v1 = vpop.eup %2240 }
 0x43c   : > { %v1064_v2 = vsel %vm703_vm4, %v2571_v1, 0.0 }
 0x43f   : > { %912 = vrot.lane.b32.xlu1 %v2489_v26, %s2304_s28 }
 0x443   : > { %1081 = vrot.lane.b32.xlu1 %v2454_v7, %s2305_s29 }
 0x44a   : > { %910 = vrot.lane.b32.xlu0 %v2454_v7, %s2304_s28 }
 0x467   : > { %895 = vadd.xlane.f32.xlu1 %v894_v61 }
 0x469   : > { %1068 = vadd.xlane.f32.xlu0 %v1067_v62 }
 0x46b   : > { %1071 = vadd.xlane.f32.xlu1 %v1070_v0 }
 0x46f   : > { %1065 = vadd.xlane.f32.xlu1 %v1064_v2 }
 0x47f   : > { %1147 = vrot.lane.b32.xlu0 %v2452_v6, %s2307_s15 }
 0x480   : > { %1083 = vrot.lane.b32.xlu1 %v2489_v26, %s2305_s29 }
 0x483   : > { %1143 = vrot.lane.b32.xlu0 %v2452_v6, %s2308_s16 }
 0x484   : > { %1149 = vrot.lane.b32.xlu1 %v2461_v12, %s2307_s15 }
 0x488   : > { %1145 = vrot.lane.b32.xlu1 %v2461_v12, %s2308_s16 }
 0x4b7   : > { %v730_v3 = vpop.xlane.xlu1 %729 }
 0x4b8   : > { %2242 = vrcp.f32 %v730_v3 }
 0x4b9   : > { %v899_v4 = vpop.xlane.xlu0 %898 }
 0x4bb   : > { %v724_v5 = vpop.xlane.xlu1 %723 }
 0x4bc   : > { %2244 = vrcp.f32 %v724_v5 }
 0x4bd   : > { %v893_v8 = vpop.xlane.xlu0 %892 }
 0x4bf   : > { %v913_v18 = vpop.permute.xlu1 %912 }
 0x4c0   : > { %v922_v19 = vsel %vm747_vm2, %v913_v18, 0 }
 0x4c1   : > { %v727_v9 = vpop.xlane.xlu0 %726 }
 0x4c2   : > { %2246 = vrcp.f32 %v727_v9  ;;  %v2243_v11 = vpop.eup %2242 }
 0x4c3   : > { %v736_v6 = vmul.f32 %v2243_v11, %v2538_v33  ;;  %v1082_v20 = vpop.permute.xlu1 %1081  ;;  %2248 = vrcp.f32 %v899_v4 }
 0x4c4   : > { %2250 = vrcp.f32 %v893_v8 }
 0x4c5   : > { %v911_v10 = vpop.permute.xlu0 %910  ;;  %v738_v12 = vpack.c.bf16 %v736_v6, %v736_v6 }
 0x4c6   : > { %2078 = vmatprep.subr.bf16.mxu1 %v911_v10  ;;  %v2245_v13 = vpop.eup %2244 }
 0x4c7   : > { %v734_v15 = vmul.f32 %v2245_v13, %v2540_v35 }
 0x4cc   : > { %v2247_v14 = vpop.eup %2246 }
 0x4cd   : > { %v735_v16 = vmul.f32 %v2247_v14, %v2233_v42  ;;  %v2249_v24 = vpop.eup %2248 }
 0x4ce   : > { %v2251_v27 = vpop.eup %2250  ;;  %v905_v30 = vmul.f32 %v2249_v24, %v2544_v37 }
 0x4cf   : > { %v737_v17 = vpack.c.bf16 %v735_v16, %v734_v15  ;;  %v903_v31 = vmul.f32 %v2251_v27, %v2548_v39 }
 0x4d0   : > { %v907_v35 = vpack.c.bf16 %v905_v30, %v905_v30 }
 0x4d1   : > { %2066 = vmatprep.mubr.msk.bf16.mxu1 %vm703_vm4, %v737_v17 }
 0x4d2   : > { %2067 = vmatmul.mubr.msk.bf16.vlgmr.msra.gmra.mrb[12].mxu1 %vm703_vm4, %v738_v12 }
 0x4d3   : > { %2079 = vmatpush3.bf16.msra.mxu1 %v911_v10 }
 0x4d4   : > { %2135 = vmatprep.subr.msk.bf16.mxu1 %vm747_vm2, %v913_v18 }
 0x4d7   : > { %2081 = vmatpush3.bf16.msra.mxu1 %v922_v19 }
 0x4d8   : > { %2094 = vmatprep.subr.bf16.mxu1 %v1082_v20 }
 0x4f4   : > { %v896_v21 = vpop.xlane.xlu1 %895 }
 0x4f5   : > { %2252 = vrcp.f32 %v896_v21 }
 0x4f6   : > { %v1069_v22 = vpop.xlane.xlu0 %1068 }
 0x4f8   : > { %v1072_v23 = vpop.xlane.xlu1 %1071 }
 0x4f9   : > { %2254 = vrcp.f32 %v1072_v23 }
 0x4fa   : > { %2256 = vrcp.f32 %v1069_v22  ;;  %v1148_v43 = vpop.permute.xlu0 %1147 }
 0x4fb   : > { %v1158_v48 = vsel %vm636_vm1, %v1148_v43, 0 }
 0x4fc   : > { %v1066_v25 = vpop.xlane.xlu1 %1065 }
 0x4fd   : > { %2258 = vrcp.f32 %v1066_v25 }
 0x4fe   : > { %v1144_v47 = vpop.permute.xlu0 %1143 }
 0x4ff   : > { %v2253_v28 = vpop.eup %2252 }
 0x500   : > { %v904_v32 = vmul.f32 %v2253_v28, %v2235_v58  ;;  %v1084_v40 = vpop.permute.xlu1 %1083 }
 0x501   : > { %v1093_v44 = vsel %vm747_vm2, %v1084_v40, 0 }
 0x502   : > { %v906_v33 = vpack.c.bf16 %v904_v32, %v903_v31 }
 0x503   : > { %v2255_v36 = vpop.eup %2254 }
 0x504   : > { %2082 = vmatprep.mubr.msk.bf16.mxu1 %vm703_vm4, %v906_v33  ;;  %v2257_v38 = vpop.eup %2256  ;;  %v1078_v42 = vmul.f32 %v2255_v36, %v2565_v63  ;;  %v1150_v49 = vpop.permute.xlu1 %1149 }
 0x505   : > { %2083 = vmatmul.mubr.msk.bf16.vlgmr.msra.gmra.mrb[16].mxu1 %vm703_vm4, %v907_v35  ;;  %v1077_v39 = vmul.f32 %v2257_v38, %v2562_v60  ;;  %v1161_v50 = vsel %vm636_vm1, %v1150_v49, 0 }
 0x506   : > { %2095 = vmatpush3.bf16.msra.mxu1 %v1082_v20  ;;  %v1080_v46 = vpack.c.bf16 %v1078_v42, %v1078_v42 }
 0x507   : > { %v2259_v41 = vpop.eup %2258  ;;  %2138 = vmatprep.subr.msk.bf16.mxu1 %vm747_vm2, %v1084_v40 }
 0x508   : > { %v1076_v37 = vmul.f32 %v2259_v41, %v2571_v1  ;;  %v1146_v51 = vpop.permute.xlu1 %1145 }
 0x50a   : > { %2097 = vmatpush3.bf16.msra.mxu1 %v1093_v44  ;;  %v1079_v45 = vpack.c.bf16 %v1077_v39, %v1076_v37 }
 0x50b   : > { %2139 = vmatprep.subr.msk.bf16.mxu1 %vm636_vm1, %v1148_v43 }
 0x50c   : > { %2098 = vmatprep.mubr.msk.bf16.mxu1 %vm703_vm4, %v1079_v45 }
 0x50d   : > { %2099 = vmatmul.mubr.msk.bf16.vlgmr.msra.gmra.mrb[20].mxu1 %vm703_vm4, %v1080_v46 }
 0x50e   : > { %2106 = vmatprep.mubr.msk.bf16.mxu1 %vm636_vm1, %v1144_v47 }
 0x513   : > { %2103 = vmatpush3.bf16.xpose.msra.mxu1 %v1158_v48  ;;  %v2186_v48 = vld [vmem:[%s2795_s5] sm:$0xff]  }
 0x514   : > { %2140 = vmatprep.subr.msk.bf16.mxu1 %vm636_vm1, %v1150_v49  ;;  %v2187_v49 = vld [vmem:[%s2795_s5 + $0x8] sm:$0xff]  }
 0x51b   : > { %2105 = vmatpush3.bf16.xpose.msra.mxu1 %v1161_v50  ;;  %v2188_v50 = vld [vmem:[%s2795_s5 + $0x10] sm:$0xff]  }
 0x522   : > { %2107 = vmatmul.mubr.msk.bf16.vlgmr.msra.gmra.mrb[24].mxu1 %vm636_vm1, %v1146_v51  ;;  %v2189_v51 = vld [vmem:[%s2795_s5 + $0x18] sm:$0xff]  }
 0x523   : > { %1618 = vmatprep.mubr.bf16.mxu1 %v2301_v29 }
 0x5a5   : > { %v2609_v52 = vpop.f32.mrb[12].mxu1 }
 0x5a6   : > { %v2611_v53 = vpop.f32.mrb[13].mxu1 }
 0x5a7   : > { %v2069_v54 = vpop.f32.mrb[14].mxu1 }
 0x5a8   : > { %v2613_v55 = vpop.f32.mrb[15].mxu1 }
 0x5d8   : > { %v2084_v58 = vpop.f32.mrb[16].mxu1 }
 0x5d9   : > { %v958_v60 = vpop.f32.mrb[17].mxu1 }
 0x5da   : > { %v2085_v61 = vpop.f32.mrb[18].mxu1 }
 0x5db   : > { %v961_v63 = vpop.f32.mrb[19].mxu1 }
 0x5dc   : > { %v2159_v62 = vpack.i.bf16 %v961_v63, %v958_v60 }
 0x5e0   : > { %v2100_v0 = vpop.f32.mrb[20].mxu1 }
 0x5e1   : > { %v1129_v1 = vpop.f32.mrb[21].mxu1 }
 0x5e2   : > { %v2101_v2 = vpop.f32.mrb[22].mxu1 }
 0x5e3   : > { %v1132_v3 = vpop.f32.mrb[23].mxu1 }
 0x5e4   : > { %v2164_v4 = vpack.i.bf16 %v1132_v3, %v1129_v1 }
 0x5f5   : > { %v2108_v5 = vpop.f32.mrb[24].mxu1 }
 0x5f6   : > { %v1197_v8 = vpop.f32.mrb[25].mxu1  ;;  %v1213_v9 = vmul.f32 0.25, %v2108_v5 }
 0x5f7   : > { %v1211_v10 = vmul.f32 0.25, %v1197_v8  ;;  %v2109_v11 = vpop.f32.mrb[26].mxu1 }
 0x5f8   : > { %v1200_v13 = vpop.f32.mrb[27].mxu1  ;;  %v1216_v17 = vsel %vm627_vm3, %v1213_v9, -1e+30 }
 0x5f9   : > { %v1212_v14 = vmul.f32 0.25, %v1200_v13  ;;  %v1214_v6 = vsel %vm627_vm3, %v1211_v10, -1e+30  ;;  %v1223_v18 = vsel %vm703_vm4, %v1216_v17, -inf }
 0x5fa   : > { %v1217_v15 = vsel %vm703_vm4, %v1214_v6, -inf }
 0x5fb   : > { %1218 = vmax.xlane.f32.xlu0 %v1217_v15  ;;  %v1215_v16 = vsel %vm627_vm3, %v1212_v14, -1e+30 }
 0x5fc   : > { %v1220_v12 = vsel %vm703_vm4, %v1215_v16, -inf }
 0x5fd   : > { %1221 = vmax.xlane.f32.xlu1 %v1220_v12 }
 0x5ff   : > { %1224 = vmax.xlane.f32.xlu0 %v1223_v18 }
 0x688   : > { %v1219_v19 = vpop.xlane.xlu0 %1218 }
 0x689   : > { %v1226_v20 = vsub.f32 %v1214_v6, %v1219_v19 }
 0x68a   : > { %v1222_v21 = vpop.xlane.xlu1 %1221 }
 0x68b   : > { %v1229_v22 = vmul.f32 1.442695, %v1226_v20  ;;  %v1227_v23 = vsub.f32 %v1215_v16, %v1222_v21 }
 0x68c   : > { %v1225_v24 = vpop.xlane.xlu0 %1224 }
 0x68d   : > { %2260 = vpow2.f32 %v1229_v22  ;;  %v1231_v25 = vmul.f32 1.442695, %v1227_v23  ;;  %v1228_v27 = vsub.f32 %v1216_v17, %v1225_v24 }
 0x68f   : > { %2262 = vpow2.f32 %v1231_v25  ;;  %v1233_v28 = vmul.f32 1.442695, %v1228_v27 }
 0x691   : > { %2264 = vpow2.f32 %v1233_v28  ;;  %v2290_v28 = vld [vmem:[%s2395_s30] sm:$0xff] }
 0x697   : > { %v2261_v34 = vpop.eup %2260 }
 0x698   : > { %v1235_v30 = vsel %vm703_vm4, %v2261_v34, 0.0 }
 0x699   : > { %v2263_v31 = vpop.eup %2262  ;;  %1236 = vadd.xlane.f32.xlu0 %v1235_v30 }
 0x69a   : > { %v1238_v35 = vsel %vm703_vm4, %v2263_v31, 0.0 }
 0x69b   : > { %v2265_v32 = vpop.eup %2264 }
 0x69c   : > { %v1241_v33 = vsel %vm703_vm4, %v2265_v32, 0.0 }
 0x69d   : > { %1242 = vadd.xlane.f32.xlu1 %v1241_v33  ;;  %1239 = vadd.xlane.f32.xlu0 %v1238_v35  ;;  %v2292_v33 = vld [vmem:[%s2395_s30 + $0x8] sm:$0xff] }
 0x6ae   : > { %1254 = vrot.lane.b32.xlu1 %v2489_v26, %s2308_s16 }
 0x6b2   : > { %2160 = vrot.lane.b32.xlu1 %v2159_v62, %s2307_s15 }
 0x6b3   : > { %1252 = vrot.lane.b32.xlu0 %v2454_v7, %s2308_s16 }
 0x6b6   : > { %1321 = vrot.lane.b32.xlu1 %v2084_v58, %s2307_s15  ;;  %s440_s15 = scalar_lea.vmem %s2803_s13, %s2142_s27 }
 0x6b7   : > { %2165 = vrot.lane.b32.xlu0 %v2164_v4, %s2306_s14 }
 0x6ba   : > { %1333 = vrot.lane.b32.xlu1 %v2100_v0, %s2306_s14 }
 0x726   : > { %v1237_v36 = vpop.xlane.xlu0 %1236 }
 0x727   : > { %2266 = vrcp.f32 %v1237_v36 }
 0x72a   : > { %v1240_v38 = vpop.xlane.xlu0 %1239  ;;  %v1243_v40 = vpop.xlane.xlu1 %1242 }
 0x72b   : > { %2268 = vrcp.f32 %v1240_v38 }
 0x72c   : > { %2270 = vrcp.f32 %v1243_v40 }
 0x72e   : > { %v1253_v41 = vpop.permute.xlu0 %1252  ;;  %v1255_v26 = vpop.permute.xlu1 %1254 }
 0x72f   : > { %2110 = vmatprep.subr.bf16.mxu0 %v1253_v41  ;;  %v1264_v7 = vsel %vm747_vm2, %v1255_v26, 0 }
 0x730   : > { %2111 = vmatpush3.bf16.msra.mxu0 %v1253_v41 }
 0x731   : > { %2141 = vmatprep.subr.msk.bf16.mxu0 %vm747_vm2, %v1255_v26  ;;  %v2267_v42 = vpop.eup %2266 }
 0x732   : > { %v1247_v39 = vmul.f32 %v2267_v42, %v2261_v34  ;;  %v2161_v62 = vpop.permute.xlu1 %2160  ;;  %v2166_v1 = vpop.permute.xlu0 %2165 }
 0x733   : > { %v2163_v2 = vunpack.i.h.bf16 %v2161_v62  ;;  %v2162_v3 = vunpack.i.l.bf16 %v2161_v62  ;;  %v2168_v5 = vunpack.i.h.bf16 %v2166_v1  ;;  %v2167_v8 = vunpack.i.l.bf16 %v2166_v1  ;;  %v2196_v62 = vld [vmem:[%s2799_s9 + $0x20] ss:$8 sps:$4 sm:$0xff]   ;;  %v2201_v1 = vld [vmem:[%s2799_s9 + $0x34] ss:$8 sps:$4 sm:$0xff]  }
 0x734   : > { %2113 = vmatpush3.bf16.msra.mxu0 %v1264_v7 }
 0x735   : > { %v2269_v43 = vpop.eup %2268  ;;  %2118 = vmatprep.subr.bf16.mxu0 %v2186_v48  ;;  %v1351_v9 = vsel %vm636_vm1, %v2613_v55, %v2163_v2  ;;  %v1350_v10 = vsel %vm636_vm1, %v2611_v53, %v2162_v3  ;;  %v2202_v2 = vld [vmem:[%s2801_s11 + $0x40] sm:$0xff]  }
 0x736   : > { %v2271_v37 = vpop.eup %2270  ;;  %v1248_v44 = vmul.f32 %v2269_v43, %v2263_v31  ;;  %v1322_v0 = vpop.permute.xlu1 %1321  ;;  %v1354_v17 = vsel %vm1353_vm5, %v1350_v10, %v2167_v8  ;;  %v1355_v12 = vsel %vm1353_vm5, %v1351_v9, %v2168_v5  ;;  %v2291_v31 = vld [vmem:[%s2395_s30 + $0x10] sm:$0xff]  ;;  %v2203_v3 = vld [vmem:[%s2801_s11] sm:$0xff]   ;;  %v2205_v5 = vld [vmem:[%s2801_s11 + $0x8] sm:$0xff]  }
 0x737   : > { %v1249_v45 = vmul.f32 %v2271_v37, %v2265_v32  ;;  %v1352_v13 = vsel %vm636_vm1, %v2609_v52, %v1322_v0  ;;  %v1950_v52 = vld [vmem:[%s2796_s6] ss:$0 sm:$0xff]  ;;  %v2199_v0 = vld [vmem:[%s2799_s9 + $0x30] ss:$8 sps:$4 sm:$0xff]  }
 0x738   : > { %v1250_v46 = vpack.c.bf16 %v1248_v44, %v1247_v39 }
 0x739   : > { %v1251_v47 = vpack.c.bf16 %v1249_v45, %v1249_v45 }
 0x73a   : > { %2114 = vmatprep.mubr.msk.bf16.mxu0 %vm703_vm4, %v1250_v46  ;;  %v1334_v4 = vpop.permute.xlu1 %1333 }
 0x73b   : > { %2115 = vmatmul.mubr.msk.bf16.vlgmr.msra.gmra.mrb[8].mxu0 %vm703_vm4, %v1251_v47  ;;  %v1356_v6 = vsel %vm1353_vm5, %v1352_v13, %v1334_v4  ;;  %v2204_v4 = vld [vmem:[%s2801_s11 + $0x48] sm:$0xff]  }
 0x73c   : > { %2119 = vmatpush3.bf16.msra.mxu0 %v2186_v48 }
 0x73d   : > { %2120 = vmatprep.subr.bf16.mxu0 %v2187_v49 }
 0x740   : > { %2121 = vmatpush3.bf16.msra.mxu0 %v2187_v49 }
 0x741   : > { %2122 = vmatprep.subr.bf16.mxu0 %v2188_v50 }
 0x744   : > { %2123 = vmatpush3.bf16.msra.mxu0 %v2188_v50 }
 0x745   : > { %2124 = vmatprep.subr.bf16.mxu0 %v2189_v51 }
 0x748   : > { %2125 = vmatpush3.bf16.msra.mxu0 %v2189_v51 }
 0x749   : > { %2026 = vmatprep.subr.bf16.mxu0 %v2202_v2 }
 0x80e   : > { %v2116_v54 = vpop.f32.mrb[8].mxu0 }
 0x80f   : > { %1345 = vrot.lane.b32.xlu1 %v2116_v54, %s2302_s23  ;;  %v1300_v58 = vpop.f32.mrb[9].mxu0  ;;  %v2192_v54 = vld [vmem:[%s2799_s9 + $0x4] ss:$8 sps:$4 sm:$0xff]  }
 0x810   : > { %v2117_v60 = vpop.f32.mrb[10].mxu0  ;;  %1586 = vmatprep.subr.bf16.mxu1 %v2192_v54 }
 0x811   : > { %v1303_v61 = vpop.f32.mrb[11].mxu0  ;;  %v2195_v60 = vld [vmem:[%s2799_s9 + $0x14] ss:$8 sps:$4 sm:$0xff]  }
 0x812   : > { %v2169_v63 = vpack.i.bf16 %v1303_v61, %v1300_v58  ;;  %v2190_v58 = vld [vmem:[%s2799_s9] ss:$8 sps:$4 sm:$0xff]   ;;  %v2193_v61 = vld [vmem:[%s2799_s9 + $0x10] ss:$8 sps:$4 sm:$0xff]  }
 0x813   : > { %1587 = vmatpush1.bf16.msra.mxu1 %v2190_v58 }
 0x814   : > { %2170 = vrot.lane.b32.xlu0 %v2169_v63, %s2302_s23  ;;  %1588 = vmatprep.subr.bf16.mxu1 %v2195_v60  ;;  %v2198_v63 = vld [vmem:[%s2799_s9 + $0x24] ss:$8 sps:$4 sm:$0xff]  }
 0x817   : > { %1589 = vmatpush1.bf16.msra.mxu1 %v2193_v61 }
 0x818   : > { %1590 = vmatprep.subr.bf16.mxu1 %v2198_v63 }
 0x81b   : > { %1591 = vmatpush1.bf16.msra.mxu1 %v2196_v62 }
 0x81c   : > { %1592 = vmatprep.subr.bf16.mxu1 %v2201_v1 }
 0x81f   : > { %1593 = vmatpush1.bf16.msra.mxu1 %v2199_v0 }
 0x881   : > { %v1346_v11 = vpop.permute.xlu1 %1345 }
 0x882   : > { %v1360_v18 = vsel %vm1357_vm6, %v1356_v6, %v1346_v11 }
 0x883   : > { %v1362_v53 = vpack.c.bf16 %v1360_v18, %v1360_v18  ;;  %v1957_v18 = vld [vmem:[%s2797_s7] ss:$0 sm:$0xff] }
 0x886   : > { %v2171_v14 = vpop.permute.xlu0 %2170 }
 0x887   : > { %v2173_v15 = vunpack.i.h.bf16 %v2171_v14  ;;  %v2172_v16 = vunpack.i.l.bf16 %v2171_v14 }
 0x889   : > { %v1358_v19 = vsel %vm1357_vm6, %v1354_v17, %v2172_v16  ;;  %v1359_v55 = vsel %vm1357_vm6, %v1355_v12, %v2173_v15 }
 0x88a   : > { %v1361_v20 = vpack.c.bf16 %v1359_v55, %v1358_v19 }
 0x88c   : > { %2126 = vmatprep.mubr.msk.bf16.mxu0 %vm447_vm0, %v1361_v20 }
 0x88d   : > { %2127 = vmatmul.mubr.msk.bf16.vlgmr.msra.gmra.mrb[12].mxu0 %vm447_vm0, %v1362_v53 }
 0x88e   : > { %2027 = vmatpush3.bf16.msra.mxu0 %v2203_v3 }
 0x88f   : > { %2028 = vmatprep.subr.bf16.mxu0 %v2204_v4 }
 0x892   : > { %2029 = vmatpush3.bf16.msra.mxu0 %v2205_v5 }
 0x960   : > { %v2128_v21 = vpop.f32.mrb[12].mxu0 }
 0x961   : > { %v1442_v22 = vpop.f32.mrb[13].mxu0  ;;  %v1451_v23 = vadd.f32 %v2128_v21, %v1950_v52 }
 0x962   : > { %v1443_v24 = vadd.f32 %v1950_v52, %v1442_v22  ;;  %v2129_v25 = vpop.f32.mrb[14].mxu0 }
 0x963   : > { %v1445_v27 = vpop.f32.mrb[15].mxu0  ;;  %v2668_v32 = vadd.f32 %v2291_v31, %v1451_v23  ;;  %v2206_v31 = vld [vmem:[%s2801_s11 + $0x50] sm:$0xff]  }
 0x964   : > { %v2665_v34 = vadd.f32 %v2290_v28, %v1443_v24  ;;  %v1446_v30 = vadd.f32 %v1950_v52, %v1445_v27  ;;  %v1958_v52 = vld [vmem:[%s2798_s8] ss:$0 sm:$0xff]  ;;  %2030 = vmatprep.subr.bf16.mxu0 %v2206_v31 }
 0x965   : > { %v1467_v40 = vsel %vm447_vm0, %v2668_v32, 0.0 }
 0x966   : > { %v2671_v35 = vadd.f32 %v2292_v33, %v1446_v30  ;;  %v1461_v36 = vsel %vm447_vm0, %v2665_v34, 0.0  ;;  %v2207_v33 = vld [vmem:[%s2801_s11 + $0x10] sm:$0xff]  }
 0x967   : > { %1462 = vadd.xlane.f32.xlu0 %v1461_v36  ;;  %2031 = vmatpush3.bf16.msra.mxu0 %v2207_v33  ;;  %v2208_v36 = vld [vmem:[%s2801_s11 + $0x58] sm:$0xff]  }
 0x968   : > { %v1464_v38 = vsel %vm447_vm0, %v2671_v35, 0.0  ;;  %2032 = vmatprep.subr.bf16.mxu0 %v2208_v36 }
 0x969   : > { %1465 = vadd.xlane.f32.xlu1 %v1464_v38  ;;  %v2210_v38 = vld [vmem:[%s2801_s11 + $0x60] sm:$0xff]  }
 0x96b   : > { %1468 = vadd.xlane.f32.xlu0 %v1467_v40  ;;  %v2211_v40 = vld [vmem:[%s2801_s11 + $0x20] sm:$0xff]  }
 0x9f4   : > { %v1463_v41 = vpop.xlane.xlu0 %1462 }
 0x9f5   : > { %v1470_v26 = vmul.f32 0.015625, %v1463_v41  ;;  %v2212_v41 = vld [vmem:[%s2801_s11 + $0x68] sm:$0xff]  }
 0x9f6   : > { %v1466_v42 = vpop.xlane.xlu1 %1465 }
 0x9f7   : > { %v1473_v7 = vsub.f32 %v2665_v34, %v1470_v26  ;;  %v1471_v43 = vmul.f32 0.015625, %v1466_v42  ;;  %v2213_v26 = vld [vmem:[%s2801_s11 + $0x28] sm:$0xff]   ;;  %v2214_v42 = vld [vmem:[%s2801_s11 + $0x70] sm:$0xff]  }
 0x9f8   : > { %v1469_v37 = vpop.xlane.xlu0 %1468 }
 0x9f9   : > { %v1474_v39 = vsub.f32 %v2671_v35, %v1471_v43  ;;  %v1472_v44 = vmul.f32 0.015625, %v1469_v37  ;;  %v1476_v45 = vmul.f32 %v1473_v7, %v1473_v7  ;;  %v2216_v43 = vld [vmem:[%s2801_s11 + $0x78] sm:$0xff]  }
 0x9fa   : > { %v2217_v37 = vld [vmem:[%s2801_s11 + $0x38] sm:$0xff]  }
 0x9fb   : > { %v1475_v46 = vsub.f32 %v2668_v32, %v1472_v44  ;;  %v1479_v47 = vsel %vm447_vm0, %v1476_v45, 0.0  ;;  %v1477_v48 = vmul.f32 %v1474_v39, %v1474_v39 }
 0x9fc   : > { %1480 = vadd.xlane.f32.xlu0 %v1479_v47 }
 0x9fd   : > { %v1478_v49 = vmul.f32 %v1475_v46, %v1475_v46  ;;  %v1482_v50 = vsel %vm447_vm0, %v1477_v48, 0.0 }
 0x9ff   : > { %v1485_v51 = vsel %vm447_vm0, %v1478_v49, 0.0 }
 0xa00   : > { %1483 = vadd.xlane.f32.xlu0 %v1482_v50  ;;  %1486 = vadd.xlane.f32.xlu1 %v1485_v51 }
 0xa89   : > { %v1481_v8 = vpop.xlane.xlu0 %1480 }
 0xa8a   : > { %v1488_v9 = vmul.f32 0.015625, %v1481_v8 }
 0xa8c   : > { %v1491_v10 = vadd.f32 1e-06, %v1488_v9 }
 0xa8d   : > { %v1487_v11 = vpop.xlane.xlu1 %1486  ;;  %v1484_v13 = vpop.xlane.xlu0 %1483 }
 0xa8e   : > { %2272 = vrsqrt.f32 %v1491_v10  ;;  %v1490_v14 = vmul.f32 0.015625, %v1487_v11  ;;  %v1489_v6 = vmul.f32 0.015625, %v1484_v13 }
 0xa90   : > { %v1493_v15 = vadd.f32 1e-06, %v1490_v14  ;;  %v1492_v16 = vadd.f32 1e-06, %v1489_v6 }
 0xa92   : > { %2274 = vrsqrt.f32 %v1493_v15 }
 0xa93   : > { %2276 = vrsqrt.f32 %v1492_v16 }
 0xa98   : > { %v2273_v17 = vpop.eup %2272 }
 0xa99   : > { %v1497_v12 = vmul.f32 %v2273_v17, %v1473_v7  ;;  %v2215_v7 = vld [vmem:[%s2801_s11 + $0x30] sm:$0xff]  }
 0xa9b   : > { %v1506_v20 = vmul.f32 %v1957_v18, %v1497_v12 }
 0xa9c   : > { %v2275_v19 = vpop.eup %2274 }
 0xa9d   : > { %v2277_v55 = vpop.eup %2276  ;;  %v1499_v21 = vmul.f32 %v2275_v19, %v1475_v46  ;;  %v1515_v23 = vadd.f32 %v1958_v52, %v1506_v20 }
 0xa9e   : > { %v1498_v53 = vmul.f32 %v2277_v55, %v1474_v39  ;;  %v1528_v39 = vld [vmem:[%s2800_s10] sm:$0x3] }
 0xa9f   : > { %v1508_v27 = vmul.f32 %v1957_v18, %v1499_v21  ;;  %v1533_v44 = vrot.slane %v1528_v39, %v520_v57  ;;  %v1537_v45 = vrot.slane %v1528_v39, %v524_v59 }
 0xaa0   : > { %v1507_v22 = vmul.f32 %v1957_v18, %v1498_v53 }
 0xaa1   : > { %v1517_v28 = vadd.f32 %v1958_v52, %v1508_v27 }
 0xaa2   : > { %v1516_v24 = vadd.f32 %v1958_v52, %v1507_v22 }
 0xaa3   : > { %v1519_v30 = vpack.c.bf16 %v1517_v28, %v1517_v28 }
 0xaa4   : > { %v1518_v25 = vpack.c.bf16 %v1516_v24, %v1515_v23 }
 0xaa6   : > { %1967 = vmatmul.mubr.msk.bf16.vlgmr.msra.gmra.mrb[28].mxu1 %vm447_vm0, %v1518_v25 }
 0xaa7   : > { %1628 = vmatprep.mubr.bf16.mxu1 %v2301_v29  ;;  %v2209_v29 = vld [vmem:[%s2801_s11 + $0x18] sm:$0xff]  }
 0xaa8   : > { %2033 = vmatpush3.bf16.msra.mxu0 %v2209_v29  ;;  %v1969_v29 = vld [vmem:[%s2802_s12] ss:$0 sm:$0xff] }
 0xaa9   : > { %2034 = vmatprep.subr.bf16.mxu0 %v2210_v38 }
 0xaac   : > { %2035 = vmatpush3.bf16.msra.mxu0 %v2211_v40 }
 0xaad   : > { %2036 = vmatprep.subr.bf16.mxu0 %v2212_v41 }
 0xaae   : > { %1968 = vmatmul.mubr.msk.bf16.gmra.mrb[32].mxu1 %vm447_vm0, %v1519_v30 }
 0xab0   : > { %2037 = vmatpush3.bf16.msra.mxu0 %v2213_v26 }
 0xab1   : > { %2038 = vmatprep.subr.bf16.mxu0 %v2214_v42 }
 0xab4   : > { %2039 = vmatpush3.bf16.msra.mxu0 %v2215_v7 }
 0xab5   : > { %2040 = vmatprep.subr.bf16.mxu0 %v2216_v43 }
 0xab8   : > { %2041 = vmatpush3.bf16.msra.mxu0 %v2217_v37 }
 0xb79   : > { %v1620_v46 = vpop.f32.mrb[28].mxu1 }
 0xb7a   : > { %v1621_v47 = vadd.f32 %v1620_v46, %v1533_v44  ;;  %v1622_v48 = vpop.f32.mrb[29].mxu1 }
 0xb7b   : > { %v1623_v49 = vadd.f32 %v1622_v48, %v1537_v45  ;;  %v1624_v50 = vpop.f32.mrb[30].mxu1 }
 0xb7c   : > { %v1643_v51 = vmul.f32 0.70710677, %v1621_v47  ;;  %v1625_v54 = vadd.f32 %v1624_v50, %v1533_v44  ;;  %v1626_v58 = vpop.f32.mrb[31].mxu1  ;;  %v1637_v14 = vmul.f32 0.5, %v1621_v47 }
 0xb7d   : > { %v1644_v60 = vmul.f32 0.70710677, %v1623_v49  ;;  %v1627_v61 = vadd.f32 %v1626_v58, %v1537_v45  ;;  %v1638_v16 = vmul.f32 0.5, %v1623_v49 }
 0xb7e   : > { %2278 = verf.f32 %v1643_v51  ;;  %v1645_v63 = vmul.f32 0.70710677, %v1625_v54  ;;  %v1639_v6 = vmul.f32 0.5, %v1625_v54 }
 0xb7f   : > { %2280 = verf.f32 %v1644_v60  ;;  %v1646_v62 = vmul.f32 0.70710677, %v1627_v61  ;;  %v1640_v17 = vmul.f32 0.5, %v1627_v61 }
 0xb80   : > { %2282 = verf.f32 %v1645_v63 }
 0xb81   : > { %2284 = verf.f32 %v1646_v62  ;;  %v1630_v57 = vpop.f32.mrb[32].mxu1 }
 0xb82   : > { %v1631_v0 = vadd.f32 %v1630_v57, %v1533_v44  ;;  %v1632_v56 = vpop.f32.mrb[33].mxu1 }
 0xb83   : > { %v1633_v59 = vadd.f32 %v1632_v56, %v1537_v45  ;;  %v1634_v1 = vpop.f32.mrb[34].mxu1 }
 0xb84   : > { %v1647_v2 = vmul.f32 0.70710677, %v1631_v0  ;;  %v1635_v3 = vpop.f32.mrb[35].mxu1  ;;  %v1641_v27 = vmul.f32 0.5, %v1631_v0 }
 0xb85   : > { %v1648_v4 = vmul.f32 0.70710677, %v1633_v59  ;;  %v1642_v24 = vmul.f32 0.5, %v1633_v59 }
 0xb86   : > { %2286 = verf.f32 %v1647_v2 }
 0xb87   : > { %2288 = verf.f32 %v1648_v4 }
 0xb88   : > { %v2279_v5 = vpop.eup %2278 }
 0xb89   : > { %v2281_v8 = vpop.eup %2280  ;;  %v1655_v9 = vadd.f32 1.0, %v2279_v5 }
 0xb8a   : > { %v2283_v10 = vpop.eup %2282  ;;  %v1656_v11 = vadd.f32 1.0, %v2281_v8 }
 0xb8b   : > { %v2285_v13 = vpop.eup %2284  ;;  %v1657_v15 = vadd.f32 1.0, %v2283_v10  ;;  %v1661_v18 = vmul.f32 %v1655_v9, %v1637_v14 }
 0xb8c   : > { %v1658_v12 = vadd.f32 1.0, %v2285_v13  ;;  %v1662_v55 = vmul.f32 %v1656_v11, %v1638_v16 }
 0xb8d   : > { %v1663_v19 = vmul.f32 %v1657_v15, %v1639_v6 }
 0xb8e   : > { %v1664_v20 = vmul.f32 %v1658_v12, %v1640_v17 }
 0xb8f   : > { %v1667_v53 = vpack.c.bf16 %v1663_v19, %v1661_v18 }
 0xb90   : > { %v2287_v52 = vpop.eup %2286  ;;  %v1668_v21 = vpack.c.bf16 %v1664_v20, %v1662_v55 }
 0xb91   : > { %v2289_v22 = vpop.eup %2288  ;;  %v1659_v23 = vadd.f32 1.0, %v2287_v52 }
 0xb92   : > { %v1660_v25 = vadd.f32 1.0, %v2289_v22  ;;  %1838 = vmatprep.mubr.bf16.mxu0 %v1668_v21 }
 0xb93   : > { %1839 = vmatmul.mubr.bf16.vlgmr.msra.gmra.mrb[16].mxu0 %v1667_v53  ;;  %v1665_v30 = vmul.f32 %v1659_v23, %v1641_v27 }
 0xb94   : > { %v1666_v28 = vmul.f32 %v1660_v25, %v1642_v24 }
 0xb95   : > { %v1669_v33 = vpack.c.bf16 %v1665_v30, %v1665_v30 }
 0xb96   : > { %v1670_v31 = vpack.c.bf16 %v1666_v28, %v1666_v28 }
 0xb98   : > { %1846 = vmatprep.mubr.bf16.mxu0 %v1670_v31 }
 0xb9b   : > { %1847 = vmatmul.mubr.bf16.gmra.mrb[20].mxu0 %v1669_v33 }
 0xc66   : > { %v2042_v36 = vpop.f32.mrb[16].mxu0 }
 0xc67   : > { %v2043_v38 = vpop.f32.mrb[17].mxu0 }
 0xc68   : > { %v2044_v40 = vadd.f32 %v2043_v38, %v2042_v36  ;;  %v2045_v41 = vpop.f32.mrb[18].mxu0 }
 0xc69   : > { %v2046_v26 = vpop.f32.mrb[19].mxu0 }
 0xc6a   : > { %v1841_v42 = vadd.f32 %v2044_v40, %v1969_v29  ;;  %v2047_v7 = vadd.f32 %v2046_v26, %v2045_v41 }
 0xc6c   : > { %v1854_v43 = vadd.f32 %v1841_v42, %v2665_v34  ;;  %v1844_v37 = vadd.f32 %v2047_v7, %v1969_v29 }
 0xc6e   : > { %1857 = vst.msk [vmem:[%s440_s15] sm:$0xff] %vm447_vm0, %v1854_v43  ;;  %v1855_v39 = vadd.f32 %v1844_v37, %v2671_v35  ;;  %v2048_v44 = vpop.f32.mrb[20].mxu0 }
 0xc6f   : > { %v2049_v45 = vpop.f32.mrb[21].mxu0 }
 0xc70   : > { %1858 = vst.msk [vmem:[%s440_s15 + $0x8] sm:$0xff] %vm447_vm0, %v1855_v39  ;;  %v2050_v46 = vadd.f32 %v2049_v45, %v2048_v44  ;;  %v2051_v47 = vpop.f32.mrb[22].mxu0 }
 0xc71   : > { %v2052_v48 = vpop.f32.mrb[23].mxu0 }
 0xc72   : > { %v1849_v49 = vadd.f32 %v2050_v46, %v1969_v29 }
 0xc74   : > { %v1856_v50 = vadd.f32 %v1849_v49, %v2668_v32 }
 0xc76   : > { %1859 = vst.msk [vmem:[%s440_s15 + $0x10] sm:$0xff] %vm447_vm0, %v1856_v50 }
 0xc77 PF: > { %s23_s25 = sadd.s32 1, %s2299_s25  }
 0xc78   : > { %p20_p4 = scmp.ge.s32.totalorder %s23_s25, 4  }
 0xc7a   :  { %22 = sbr.rel (!%p20_p4) target bundleno = 1 (0x1), region = 102 }

</bundles_post_ra>
